<compile_context>
chip_gen: v6e
topology: v6e:2x2x1
jax: 0.10.0
libtpu: 0.0.40
codegen_flags: <defaults>
</compile_context>

<pallas_src>
import functools

import jax
import jax.numpy as jnp
from jax.experimental import pallas as pl
from jax.experimental.pallas import tpu as pltpu


# ---------------------------------------------------------------------------
# Helpers
# ---------------------------------------------------------------------------
def _round_up(x, m):
    return ((x + m - 1) // m) * m


def _pick_row_tile(oh, ow, max_rows=1024):
    """Largest divisor TH of OH with TH*OW <= max_rows and TH*OW % 8 == 0."""
    for cand in range(oh, 0, -1):
        if oh % cand == 0 and cand * ow <= max_rows and (cand * ow) % 8 == 0:
            return cand
    return oh  # block == full array extent is always legal


def _pick_m_tile(total, max_rows=4096):
    """Largest divisor of `total` that is <= max_rows and a multiple of 8."""
    best = None
    for cand in range(1, total + 1):
        if total % cand == 0 and cand <= max_rows and cand % 8 == 0:
            best = cand
    return best if best is not None else total


# ---------------------------------------------------------------------------
# Pass 1: fused im2col-in-VMEM + single MXU matmul + BN partial stats
# ---------------------------------------------------------------------------
def _conv_bn_stats_kernel(x_ref, w_ref, y_ref, stats_ref, xpad_ref, *,
                          th, ow, stride, dilation, kh_tot, kw_tot, padding):
    """One output-row group (TH rows of the output image) per grid step.

    x_ref:     (H, W, Cin)             bf16  unpadded NHWC image of batch b
                                             (re-DMA'd only when b changes)
    w_ref:     (KH*KW*Cin, Cp)         bf16  flattened, channel-padded weight
    y_ref:     (TH*OW, Cp)             bf16  conv output rows for this step
    stats_ref: (8, Cp)                 f32   rows 0/1 = [sum, sum_sq]; revisited
                                             across t, written to HBM once per b
    xpad_ref:  (Hp, Wp, Cin) scratch   bf16  zero-padded image, filled at t == 0
    """
    t = pl.program_id(1)
    h, w, cin = x_ref.shape

    # Build the zero-padded image slab in VMEM once per batch element
    # (removes the jnp.pad HBM pass from the wrapper).
    @pl.when(t == 0)
    def _():
        xpad_ref[...] = jnp.zeros_like(xpad_ref)
        xpad_ref[padding:padding + h, padding:padding + w, :] = x_ref[...]

    rows_in = (th - 1) * stride + (kh_tot - 1) * dilation + 1
    row0 = t * (th * stride)
    slab = xpad_ref[pl.ds(row0, rows_in)]            # (rows_in, Wp, Cin) bf16

    # im2col patch for this row group, assembled in vregs (no HBM / VMEM
    # round-trip), ordered (kh, kw, cin) to match the flattened weight rows.
    pieces = []
    for kh in range(kh_tot):
        for kw in range(kw_tot):
            sub = slab[kh * dilation:
                       kh * dilation + (th - 1) * stride + 1: stride,
                       kw * dilation:
                       kw * dilation + (ow - 1) * stride + 1: stride, :]
            pieces.append(sub.reshape(th * ow, cin))
    patch = jnp.concatenate(pieces, axis=-1)         # (TH*OW, KH*KW*Cin) bf16

    # Single MXU contraction (was 9 dots + 9 full-tile f32 accumulate passes).
    acc = jnp.dot(patch, w_ref[...], preferred_element_type=jnp.float32)
    y_ref[...] = acc.astype(y_ref.dtype)             # bf16 intermediate

    # BN partial sums on the (near-idle) MXU instead of the VPU.
    ones = jnp.ones((1, th * ow), jnp.float32)
    s1 = jnp.dot(ones, acc, preferred_element_type=jnp.float32)        # (1, Cp)
    s2 = jnp.dot(ones, acc * acc, preferred_element_type=jnp.float32)  # (1, Cp)

    @pl.when(t == 0)
    def _():
        stats_ref[...] = jnp.zeros_like(stats_ref)
    stats_ref[0:1, :] += s1
    stats_ref[1:2, :] += s2


# ---------------------------------------------------------------------------
# Pass 2: BN apply + ReLU (+ channel un-padding fused into the output block)
# ---------------------------------------------------------------------------
def _bn_relu_kernel(y_ref, scale_ref, shift_ref, o_ref):
    # y_ref: (TM, Cp) bf16;  scale/shift: (1, Cp) f32;  o_ref: (TM, Cout) f32.
    y = y_ref[...].astype(jnp.float32)
    z = jnp.maximum(y * scale_ref[...] + shift_ref[...], 0.0)
    o_ref[...] = z[:, :o_ref.shape[-1]]


# ---------------------------------------------------------------------------
# Forward
# ---------------------------------------------------------------------------
def basic_conv_forward(x_nchw, weight_oihw, gamma, beta,
                       stride=1, padding=0, dilation=1, eps=1e-5):
    """BasicConv forward: Conv2d(bias=False) -> BatchNorm2d(train mode) -> ReLU."""
    n, cin, h, w = x_nchw.shape
    cout, cin_w, kh, kw = weight_oihw.shape
    assert cin_w == cin, "groups != 1 is not supported"

    oh = (h + 2 * padding - dilation * (kh - 1) - 1) // stride + 1
    ow = (w + 2 * padding - dilation * (kw - 1) - 1) // stride + 1
    hp, wp = h + 2 * padding, w + 2 * padding
    cp = _round_up(cout, 128)                       # lane-dense channel dim
    kdim = kh * kw * cin

    # Single NHWC-transpose + bf16-cast pass (no separate pad pass).
    x_nhwc = jnp.transpose(x_nchw, (0, 2, 3, 1)).astype(jnp.bfloat16)
    w_hwio = jnp.transpose(weight_oihw, (2, 3, 1, 0)).astype(jnp.bfloat16)
    if cp != cout:
        w_hwio = jnp.pad(w_hwio, ((0, 0), (0, 0), (0, 0), (0, cp - cout)))
    w2 = w_hwio.reshape(kdim, cp)                   # (KH*KW*Cin, Cp)

    th = _pick_row_tile(oh, ow)
    n_th = oh // th
    thow = th * ow

    conv_kernel = functools.partial(
        _conv_bn_stats_kernel, th=th, ow=ow, stride=stride, dilation=dilation,
        kh_tot=kh, kw_tot=kw, padding=padding)

    # ---- pass 1: conv matmul + fused BN partial stats ----
    y3, stats = pl.pallas_call(
        conv_kernel,
        out_shape=(
            jax.ShapeDtypeStruct((n, oh * ow, cp), jnp.bfloat16),
            jax.ShapeDtypeStruct((n, 8, cp), jnp.float32),
        ),
        grid_spec=pltpu.PrefetchScalarGridSpec(
            num_scalar_prefetch=0,
            grid=(n, n_th),
            in_specs=[
                # Whole unpadded image per batch element; re-fetched only when
                # the batch index changes.
                pl.BlockSpec((None, h, w, cin), lambda b, t: (b, 0, 0, 0)),
                # Flattened weight, resident across the grid.
                pl.BlockSpec((kdim, cp), lambda b, t: (0, 0)),
            ],
            out_specs=[
                pl.BlockSpec((None, thow, cp), lambda b, t: (b, t, 0)),
                # Revisited across t -> accumulated in VMEM, written once per b.
                pl.BlockSpec((None, 8, cp), lambda b, t: (b, 0, 0)),
            ],
            scratch_shapes=[pltpu.VMEM((hp, wp, cin), jnp.bfloat16)],
        ),
        compiler_params=pltpu.CompilerParams(
            dimension_semantics=("parallel", "arbitrary"),
            vmem_limit_bytes=64 * 1024 * 1024),
    )(x_nhwc, w2)

    # ---- tiny per-channel reduction of the partial stats (plain JAX) ----
    count = n * oh * ow
    ssum = jnp.sum(stats[:, 0, :], axis=0)                     # (Cp,)
    ssq = jnp.sum(stats[:, 1, :], axis=0)                      # (Cp,)
    mean = ssum / count
    var = jnp.maximum(ssq / count - mean * mean, 0.0)          # biased (BN train)
    gamma_p = jnp.pad(gamma.astype(jnp.float32), (0, cp - cout))
    beta_p = jnp.pad(beta.astype(jnp.float32), (0, cp - cout))
    scale_v = gamma_p * jax.lax.rsqrt(var + eps)               # (Cp,)
    shift_v = beta_p - mean * scale_v                          # (Cp,)
    scale2d = scale_v.reshape(1, cp)
    shift2d = shift_v.reshape(1, cp)

    # ---- pass 2: BN apply + ReLU; writes only Cout channels (slice fused) ----
    tm2 = _pick_m_tile(oh * ow, 4096)
    n_m2 = (oh * ow) // tm2

    out2 = pl.pallas_call(
        _bn_relu_kernel,
        out_shape=jax.ShapeDtypeStruct((n, oh * ow, cout), jnp.float32),
        grid_spec=pltpu.PrefetchScalarGridSpec(
            num_scalar_prefetch=0,
            grid=(n, n_m2),
            in_specs=[
                pl.BlockSpec((None, tm2, cp), lambda b, m: (b, m, 0)),
                pl.BlockSpec((1, cp), lambda b, m: (0, 0)),
                pl.BlockSpec((1, cp), lambda b, m: (0, 0)),
            ],
            out_specs=pl.BlockSpec((None, tm2, cout), lambda b, m: (b, m, 0)),
        ),
        compiler_params=pltpu.CompilerParams(
            dimension_semantics=("parallel", "parallel"),
            vmem_limit_bytes=64 * 1024 * 1024),
    )(y3, scale2d, shift2d)

    out_nhwc = out2.reshape(n, oh, ow, cout)
    return jnp.transpose(out_nhwc, (0, 3, 1, 2))               # back to NCHW


# ---------------------------------------------------------------------------
# Pure-JAX reference (module semantics, f32)
# ---------------------------------------------------------------------------
def _reference_forward(x_nchw, weight_oihw, gamma, beta,
                       stride=1, padding=0, dilation=1, eps=1e-5):
    y = jax.lax.conv_general_dilated(
        x_nchw.astype(jnp.float32), weight_oihw.astype(jnp.float32),
        window_strides=(stride, stride),
        padding=[(padding, padding), (padding, padding)],
        rhs_dilation=(dilation, dilation),
        dimension_numbers=("NCHW", "OIHW", "NCHW"),
        preferred_element_type=jnp.float32)
    mean = jnp.mean(y, axis=(0, 2, 3), keepdims=True)
    var = jnp.mean((y - mean) ** 2, axis=(0, 2, 3), keepdims=True)
    yhat = (y - mean) * jax.lax.rsqrt(var + eps)
    yhat = yhat * gamma.reshape(1, -1, 1, 1) + beta.reshape(1, -1, 1, 1)
    return jnp.maximum(yhat, 0.0)


if __name__ == "__main__":
    # BasicConv(in_planes=4, out_planes=8, kernel_size=3, stride=1, padding=1)
    N, Cin, H, W = 2, 4, 16, 16
    Cout, KH, KW = 8, 3, 3
    stride, padding, dilation = 1, 1, 1

    key = jax.random.PRNGKey(0)
    k1, k2, k3, k4 = jax.random.split(key, 4)
    x = jax.random.normal(k1, (N, Cin, H, W), jnp.float32)
    weight = jax.random.normal(k2, (Cout, Cin, KH, KW), jnp.float32) * 0.1
    gamma = 1.0 + 0.1 * jax.random.normal(k3, (Cout,), jnp.float32)
    beta = 0.1 * jax.random.normal(k4, (Cout,), jnp.float32)

    fwd = jax.jit(functools.partial(basic_conv_forward, stride=stride,
                                    padding=padding, dilation=dilation))
    out = jax.block_until_ready(fwd(x, weight, gamma, beta))

    ref = _reference_forward(x, weight, gamma, beta,
                             stride=stride, padding=padding, dilation=dilation)
    max_err = float(jnp.max(jnp.abs(out - ref)))
    assert out.shape == (N, Cout, H, W), out.shape
    # bf16 MXU operands + bf16 intermediate vs f32 reference -> relaxed tolerance.
    assert max_err < 5e-2, f"max abs error {max_err}"

    print("KERNEL_OK")
</pallas_src>

<mosaic_0001>
module attributes {stable_mosaic.version = 11 : i64} {
  func.func @_bn_relu_kernel(%arg0: i32, %arg1: i32, %arg2: memref<1x256x128xbf16, #tpu.memory_space<vmem>>, %arg3: memref<1x128xf32, #tpu.memory_space<vmem>>, %arg4: memref<1x128xf32, #tpu.memory_space<vmem>>, %arg5: memref<1x256x8xf32, #tpu.memory_space<vmem>>) attributes {dimension_semantics = [#tpu.dimension_semantics<parallel>, #tpu.dimension_semantics<parallel>], iteration_bounds = array<i64: 2, 1>, scalar_prefetch = 0 : i64, scratch_operands = 0 : i64, tpu.core_type = #tpu.core_type<tc>, window_params = [{transform_indices = @transform_0, window_bounds = array<i64: 1, 256, 128>}, {pipeline_mode = #tpu.pipeline_mode<synchronous>, transform_indices = @transform_1, window_bounds = array<i64: 1, 128>}, {pipeline_mode = #tpu.pipeline_mode<synchronous>, transform_indices = @transform_2, window_bounds = array<i64: 1, 128>}, {transform_indices = @transform_3, window_bounds = array<i64: 1, 256, 8>}]} {
    %c0 = arith.constant 0 : index
    %c0_0 = arith.constant 0 : index
    %c0_1 = arith.constant 0 : index
    %0 = vector.load %arg2[%c0, %c0_0, %c0_1] : memref<1x256x128xbf16, #tpu.memory_space<vmem>>, vector<1x256x128xbf16>
    %1 = vector.shape_cast %0 : vector<1x256x128xbf16> to vector<256x128xbf16>
    %2 = arith.extf %1 : vector<256x128xbf16> to vector<256x128xf32>
    %c0_2 = arith.constant 0 : index
    %c0_3 = arith.constant 0 : index
    %3 = vector.load %arg3[%c0_2, %c0_3] : memref<1x128xf32, #tpu.memory_space<vmem>>, vector<1x128xf32>
    %4 = vector.broadcast %3 : vector<1x128xf32> to vector<256x128xf32>
    %5 = arith.mulf %2, %4 : vector<256x128xf32>
    %c0_4 = arith.constant 0 : index
    %c0_5 = arith.constant 0 : index
    %6 = vector.load %arg4[%c0_4, %c0_5] : memref<1x128xf32, #tpu.memory_space<vmem>>, vector<1x128xf32>
    %7 = vector.broadcast %6 : vector<1x128xf32> to vector<256x128xf32>
    %8 = arith.addf %5, %7 : vector<256x128xf32>
    %cst = arith.constant 0.000000e+00 : f32
    %9 = vector.broadcast %cst : f32 to vector<256x128xf32>
    %10 = arith.maximumf %8, %9 : vector<256x128xf32>
    %11 = vector.extract_strided_slice %10 {offsets = [0, 0], sizes = [256, 8], strides = [1, 1]} : vector<256x128xf32> to vector<256x8xf32>
    %c0_6 = arith.constant 0 : index
    %c0_7 = arith.constant 0 : index
    %c0_8 = arith.constant 0 : index
    %12 = vector.load %arg5[%c0_6, %c0_7, %c0_8] : memref<1x256x8xf32, #tpu.memory_space<vmem>>, vector<1x256x8xf32>
    %13 = vector.shape_cast %12 : vector<1x256x8xf32> to vector<256x8xf32>
    %14 = vector.shape_cast %11 : vector<256x8xf32> to vector<1x256x8xf32>
    tpu.vector_store %arg5[%c0_6, %c0_7, %c0_8], %14 {strides = array<i32>} : memref<1x256x8xf32, #tpu.memory_space<vmem>>, vector<1x256x8xf32>,
    return
  }
  func.func @transform_0(%arg0: i32, %arg1: i32) -> (i32, i32, i32) {
    %c0_i32 = arith.constant 0 : i32
    %c0_i32_0 = arith.constant 0 : i32
    return %arg0, %arg1, %c0_i32 : i32, i32, i32
  }
  func.func @transform_1(%arg0: i32, %arg1: i32) -> (i32, i32) {
    %c0_i32 = arith.constant 0 : i32
    %c0_i32_0 = arith.constant 0 : i32
    %c0_i32_1 = arith.constant 0 : i32
    return %c0_i32, %c0_i32_0 : i32, i32
  }
  func.func @transform_2(%arg0: i32, %arg1: i32) -> (i32, i32) {
    %c0_i32 = arith.constant 0 : i32
    %c0_i32_0 = arith.constant 0 : i32
    %c0_i32_1 = arith.constant 0 : i32
    return %c0_i32, %c0_i32_0 : i32, i32
  }
  func.func @transform_3(%arg0: i32, %arg1: i32) -> (i32, i32, i32) {
    %c0_i32 = arith.constant 0 : i32
    %c0_i32_0 = arith.constant 0 : i32
    return %arg0, %arg1, %c0_i32 : i32, i32, i32
  }
}

module attributes {stable_mosaic.version = 11 : i64} {
  func.func @_conv_bn_stats_kernel(%arg0: i32, %arg1: i32, %arg2: memref<1x16x16x4xbf16, #tpu.memory_space<vmem>>, %arg3: memref<36x128xbf16, #tpu.memory_space<vmem>>, %arg4: memref<1x256x128xbf16, #tpu.memory_space<vmem>>, %arg5: memref<1x8x128xf32, #tpu.memory_space<vmem>>, %arg6: memref<18x18x4xbf16, #tpu.memory_space<vmem>>) attributes {dimension_semantics = [#tpu.dimension_semantics<parallel>, #tpu.dimension_semantics<arbitrary>], iteration_bounds = array<i64: 2, 1>, scalar_prefetch = 0 : i64, scratch_operands = 1 : i64, tpu.core_type = #tpu.core_type<tc>, window_params = [{transform_indices = @transform_0, window_bounds = array<i64: 1, 16, 16, 4>}, {pipeline_mode = #tpu.pipeline_mode<synchronous>, transform_indices = @transform_1, window_bounds = array<i64: 36, 128>}, {transform_indices = @transform_2, window_bounds = array<i64: 1, 256, 128>}, {transform_indices = @transform_3, window_bounds = array<i64: 1, 8, 128>}]} {
    %c0_i32 = arith.constant 0 : i32
    %0 = arith.cmpi eq, %arg1, %c0_i32 : i32
    %1 = arith.extui %0 : i1 to i32
    %c0_i32_0 = arith.constant 0 : i32
    %2 = arith.cmpi ne, %1, %c0_i32_0 : i32
    scf.if %2 {
      %cst_23 = arith.constant 0.000000e+00 : bf16
      %50 = vector.broadcast %cst_23 : bf16 to vector<18x18x4xbf16>
      %c0_24 = arith.constant 0 : index
      %c0_25 = arith.constant 0 : index
      %c0_26 = arith.constant 0 : index
      %51 = vector.load %arg6[%c0_24, %c0_25, %c0_26] : memref<18x18x4xbf16, #tpu.memory_space<vmem>>, vector<18x18x4xbf16>
      tpu.vector_store %arg6[%c0_24, %c0_25, %c0_26], %50 {strides = array<i32>} : memref<18x18x4xbf16, #tpu.memory_space<vmem>>, vector<18x18x4xbf16>,
      %c0_27 = arith.constant 0 : index
      %c0_28 = arith.constant 0 : index
      %c0_29 = arith.constant 0 : index
      %c0_30 = arith.constant 0 : index
      %52 = vector.load %arg2[%c0_27, %c0_28, %c0_29, %c0_30] : memref<1x16x16x4xbf16, #tpu.memory_space<vmem>>, vector<1x16x16x4xbf16>
      %53 = vector.shape_cast %52 : vector<1x16x16x4xbf16> to vector<16x16x4xbf16>
      %c1_31 = arith.constant 1 : index
      %c1_32 = arith.constant 1 : index
      %c0_33 = arith.constant 0 : index
      %54 = vector.load %arg6[%c1_31, %c1_32, %c0_33] : memref<18x18x4xbf16, #tpu.memory_space<vmem>>, vector<16x16x4xbf16>
      tpu.vector_store %arg6[%c1_31, %c1_32, %c0_33], %53 {strides = array<i32>} : memref<18x18x4xbf16, #tpu.memory_space<vmem>>, vector<16x16x4xbf16>,
    } else {
    }
    %c16_i32 = arith.constant 16 : i32
    %3 = arith.muli %arg1, %c16_i32 : i32
    %4 = arith.index_cast %3 : i32 to index
    %c0 = arith.constant 0 : index
    %c0_1 = arith.constant 0 : index
    %5 = vector.load %arg6[%4, %c0, %c0_1] : memref<18x18x4xbf16, #tpu.memory_space<vmem>>, vector<18x18x4xbf16>
    %6 = vector.extract_strided_slice %5 {offsets = [0, 0, 0], sizes = [16, 16, 4], strides = [1, 1, 1]} : vector<18x18x4xbf16> to vector<16x16x4xbf16>
    %7 = vector.shape_cast %6 : vector<16x16x4xbf16> to vector<256x4xbf16>
    %8 = vector.extract_strided_slice %5 {offsets = [0, 1, 0], sizes = [16, 16, 4], strides = [1, 1, 1]} : vector<18x18x4xbf16> to vector<16x16x4xbf16>
    %9 = vector.shape_cast %8 : vector<16x16x4xbf16> to vector<256x4xbf16>
    %10 = vector.extract_strided_slice %5 {offsets = [0, 2, 0], sizes = [16, 16, 4], strides = [1, 1, 1]} : vector<18x18x4xbf16> to vector<16x16x4xbf16>
    %11 = vector.shape_cast %10 : vector<16x16x4xbf16> to vector<256x4xbf16>
    %12 = vector.extract_strided_slice %5 {offsets = [1, 0, 0], sizes = [16, 16, 4], strides = [1, 1, 1]} : vector<18x18x4xbf16> to vector<16x16x4xbf16>
    %13 = vector.shape_cast %12 : vector<16x16x4xbf16> to vector<256x4xbf16>
    %14 = vector.extract_strided_slice %5 {offsets = [1, 1, 0], sizes = [16, 16, 4], strides = [1, 1, 1]} : vector<18x18x4xbf16> to vector<16x16x4xbf16>
    %15 = vector.shape_cast %14 : vector<16x16x4xbf16> to vector<256x4xbf16>
    %16 = vector.extract_strided_slice %5 {offsets = [1, 2, 0], sizes = [16, 16, 4], strides = [1, 1, 1]} : vector<18x18x4xbf16> to vector<16x16x4xbf16>
    %17 = vector.shape_cast %16 : vector<16x16x4xbf16> to vector<256x4xbf16>
    %18 = vector.extract_strided_slice %5 {offsets = [2, 0, 0], sizes = [16, 16, 4], strides = [1, 1, 1]} : vector<18x18x4xbf16> to vector<16x16x4xbf16>
    %19 = vector.shape_cast %18 : vector<16x16x4xbf16> to vector<256x4xbf16>
    %20 = vector.extract_strided_slice %5 {offsets = [2, 1, 0], sizes = [16, 16, 4], strides = [1, 1, 1]} : vector<18x18x4xbf16> to vector<16x16x4xbf16>
    %21 = vector.shape_cast %20 : vector<16x16x4xbf16> to vector<256x4xbf16>
    %22 = vector.extract_strided_slice %5 {offsets = [2, 2, 0], sizes = [16, 16, 4], strides = [1, 1, 1]} : vector<18x18x4xbf16> to vector<16x16x4xbf16>
    %23 = vector.shape_cast %22 : vector<16x16x4xbf16> to vector<256x4xbf16>
    %24 = tpu.concatenate %7, %9, %11, %13, %15, %17, %19, %21, %23 in 1 : vector<256x4xbf16>, vector<256x4xbf16>, vector<256x4xbf16>, vector<256x4xbf16>, vector<256x4xbf16>, vector<256x4xbf16>, vector<256x4xbf16>, vector<256x4xbf16>, vector<256x4xbf16> -> vector<256x36xbf16>
    %c0_2 = arith.constant 0 : index
    %c0_3 = arith.constant 0 : index
    %25 = vector.load %arg3[%c0_2, %c0_3] : memref<36x128xbf16, #tpu.memory_space<vmem>>, vector<36x128xbf16>
    %cst = arith.constant dense<0.000000e+00> : vector<256x128xf32>
    %26 = tpu.matmul %24, %25, %cst {dimension_numbers = #tpu.dot_dimension_numbers<[1], [0], [0], [1], [0, 0, 1, 1], [], []>} : vector<256x36xbf16>, vector<36x128xbf16>, vector<256x128xf32> -> vector<256x128xf32>
    %27 = arith.truncf %26 : vector<256x128xf32> to vector<256x128xbf16>
    %c0_4 = arith.constant 0 : index
    %c0_5 = arith.constant 0 : index
    %c0_6 = arith.constant 0 : index
    %28 = vector.load %arg4[%c0_4, %c0_5, %c0_6] : memref<1x256x128xbf16, #tpu.memory_space<vmem>>, vector<1x256x128xbf16>
    %29 = vector.shape_cast %28 : vector<1x256x128xbf16> to vector<256x128xbf16>
    %30 = vector.shape_cast %27 : vector<256x128xbf16> to vector<1x256x128xbf16>
    tpu.vector_store %arg4[%c0_4, %c0_5, %c0_6], %30 {strides = array<i32>} : memref<1x256x128xbf16, #tpu.memory_space<vmem>>, vector<1x256x128xbf16>,
    %cst_7 = arith.constant 1.000000e+00 : f32
    %31 = vector.broadcast %cst_7 : f32 to vector<1x256xf32>
    %cst_8 = arith.constant dense<0.000000e+00> : vector<1x128xf32>
    %32 = tpu.matmul %31, %26, %cst_8 {dimension_numbers = #tpu.dot_dimension_numbers<[1], [0], [0], [1], [0, 0, 1, 1], [], []>} : vector<1x256xf32>, vector<256x128xf32>, vector<1x128xf32> -> vector<1x128xf32>
    %33 = arith.mulf %26, %26 : vector<256x128xf32>
    %cst_9 = arith.constant dense<0.000000e+00> : vector<1x128xf32>
    %34 = tpu.matmul %31, %33, %cst_9 {dimension_numbers = #tpu.dot_dimension_numbers<[1], [0], [0], [1], [0, 0, 1, 1], [], []>} : vector<1x256xf32>, vector<256x128xf32>, vector<1x128xf32> -> vector<1x128xf32>
    %c0_i32_10 = arith.constant 0 : i32
    %35 = arith.cmpi eq, %arg1, %c0_i32_10 : i32
    %36 = arith.extui %35 : i1 to i32
    %c0_i32_11 = arith.constant 0 : i32
    %37 = arith.cmpi ne, %36, %c0_i32_11 : i32
    scf.if %37 {
      %cst_23 = arith.constant 0.000000e+00 : f32
      %50 = vector.broadcast %cst_23 : f32 to vector<8x128xf32>
      %c0_24 = arith.constant 0 : index
      %c0_25 = arith.constant 0 : index
      %c0_26 = arith.constant 0 : index
      %51 = vector.load %arg5[%c0_24, %c0_25, %c0_26] : memref<1x8x128xf32, #tpu.memory_space<vmem>>, vector<1x8x128xf32>
      %52 = vector.shape_cast %51 : vector<1x8x128xf32> to vector<8x128xf32>
      %53 = vector.shape_cast %50 : vector<8x128xf32> to vector<1x8x128xf32>
      tpu.vector_store %arg5[%c0_24, %c0_25, %c0_26], %53 {strides = array<i32>} : memref<1x8x128xf32, #tpu.memory_space<vmem>>, vector<1x8x128xf32>,
    } else {
    }
    %c0_12 = arith.constant 0 : index
    %c0_13 = arith.constant 0 : index
    %c0_14 = arith.constant 0 : index
    %38 = vector.load %arg5[%c0_12, %c0_13, %c0_14] : memref<1x8x128xf32, #tpu.memory_space<vmem>>, vector<1x1x128xf32>
    %39 = vector.shape_cast %38 : vector<1x1x128xf32> to vector<1x128xf32>
    %40 = arith.addf %39, %32 : vector<1x128xf32>
    %c0_15 = arith.constant 0 : index
    %c0_16 = arith.constant 0 : index
    %c0_17 = arith.constant 0 : index
    %41 = vector.load %arg5[%c0_15, %c0_16, %c0_17] : memref<1x8x128xf32, #tpu.memory_space<vmem>>, vector<1x1x128xf32>
    %42 = vector.shape_cast %41 : vector<1x1x128xf32> to vector<1x128xf32>
    %43 = vector.shape_cast %40 : vector<1x128xf32> to vector<1x1x128xf32>
    tpu.vector_store %arg5[%c0_15, %c0_16, %c0_17], %43 {strides = array<i32>} : memref<1x8x128xf32, #tpu.memory_space<vmem>>, vector<1x1x128xf32>,
    %c0_18 = arith.constant 0 : index
    %c1 = arith.constant 1 : index
    %c0_19 = arith.constant 0 : index
    %44 = vector.load %arg5[%c0_18, %c1, %c0_19] : memref<1x8x128xf32, #tpu.memory_space<vmem>>, vector<1x1x128xf32>
    %45 = vector.shape_cast %44 : vector<1x1x128xf32> to vector<1x128xf32>
    %46 = arith.addf %45, %34 : vector<1x128xf32>
    %c0_20 = arith.constant 0 : index
    %c1_21 = arith.constant 1 : index
    %c0_22 = arith.constant 0 : index
    %47 = vector.load %arg5[%c0_20, %c1_21, %c0_22] : memref<1x8x128xf32, #tpu.memory_space<vmem>>, vector<1x1x128xf32>
    %48 = vector.shape_cast %47 : vector<1x1x128xf32> to vector<1x128xf32>
    %49 = vector.shape_cast %46 : vector<1x128xf32> to vector<1x1x128xf32>
    tpu.vector_store %arg5[%c0_20, %c1_21, %c0_22], %49 {strides = array<i32>} : memref<1x8x128xf32, #tpu.memory_space<vmem>>, vector<1x1x128xf32>,
    return
  }
  func.func @transform_0(%arg0: i32, %arg1: i32) -> (i32, i32, i32, i32) {
    %c0_i32 = arith.constant 0 : i32
    %c0_i32_0 = arith.constant 0 : i32
    %c0_i32_1 = arith.constant 0 : i32
    %c0_i32_2 = arith.constant 0 : i32
    return %arg0, %c0_i32, %c0_i32_0, %c0_i32_1 : i32, i32, i32, i32
  }
  func.func @transform_1(%arg0: i32, %arg1: i32) -> (i32, i32) {
    %c0_i32 = arith.constant 0 : i32
    %c0_i32_0 = arith.constant 0 : i32
    %c0_i32_1 = arith.constant 0 : i32
    return %c0_i32, %c0_i32_0 : i32, i32
  }
  func.func @transform_2(%arg0: i32, %arg1: i32) -> (i32, i32, i32) {
    %c0_i32 = arith.constant 0 : i32
    %c0_i32_0 = arith.constant 0 : i32
    return %arg0, %arg1, %c0_i32 : i32, i32, i32
  }
  func.func @transform_3(%arg0: i32, %arg1: i32) -> (i32, i32, i32) {
    %c0_i32 = arith.constant 0 : i32
    %c0_i32_0 = arith.constant 0 : i32
    %c0_i32_1 = arith.constant 0 : i32
    return %arg0, %c0_i32, %c0_i32_0 : i32, i32, i32
  }
}

</mosaic_0001>

<bundles_post_ra>
// kernel: basic_conv_forward.3
= control target key start
LH: loop header
LB: loop body
LE: loop exit
PB: predicated region body
PF: predicated region fallthrough
CT: control target
= control target key end

     0   :  { %s666_s12 = smov 0   ;;  %s668_s13 = smov 0   ;;  %s861_s0 = inlined_call_operand.vmem [shape: bf16[2,256,128], index: 0, kind: input, shape index: {}]   ;;  %s862_s1 = inlined_call_operand.vmem [shape: f32[1,128], index: 1, kind: input, shape index: {}]   ;;  %s863_s2 = inlined_call_operand.vmem [shape: f32[1,128], index: 2, kind: input, shape index: {}]   ;;  %s864_s3 = inlined_call_operand.vmem [shape: f32[2,256,8], index: 3, kind: output, shape index: {}]  }
   0x1   :  { %s670_s14 = smov 0  }
   0x2 LB: > { %s25_s15 = sadd.s32 1, %s640_s13  ;;  %p508_p0 = scmp.ge.s32.totalorder %s644_s14, 1  ;;  %s644_s14 = sphi %s670_s14, %s13_s14   ;;  %s640_s13 = sphi %s668_s13, %s866_s13   ;;  %s636_s12 = sphi %s666_s12, %s865_s12  }
   0x3   : > { %p27_p1 = scmp.ge.s32.totalorder %s25_s15, 2  ;;  %p158_p2 = scmp.lt.s32.totalorder %s644_s14, 3 }
   0x5   : > { %s868_s15 = smov (%p27_p1, %s25_s15), 0  ;;  %p159_p3 = pnand %p508_p0, %p158_p2 }
   0x6   : > { %p191_p4 = scmp.lt.s32.totalorder (!%p159_p3), %s636_s12, 1 }
   0x7   : > { %162 = sbr.rel (%p159_p3) target bundleno = 52 (0x34), region = 32 }
   0xc   : > { %s870_s12 = smov (!%p191_p4, %s636_s12), 1  ;;  %v695_v0 = vld [vmem:[%s862_s1] ss:$0 sm:$0xff]  ;;  %vm384_vm0 = vcmask 64512  }
   0xd   : > { %s517_s16 = sshll.u32 %s870_s12, 7  ;;  %v704_v9 = vld [vmem:[%s863_s2] ss:$0 sm:$0xff]  ;;  %s518_s24 = sshll.u32 %s870_s12, 8 }
   0xe   : > { %s690_s19 = scalar_lea.vmem %s861_s0, %s517_s16  ;;  %s722_s27 = scalar_lea.vmem %s864_s3, %s518_s24 }
   0xf   : > { %v520_v1 = vld [vmem:[%s690_s19] sm:$0xff]   ;;  %v583_v2 = vld [vmem:[%s690_s19 + $0x8] sm:$0xff]   ;;  %v584_v3 = vld [vmem:[%s690_s19 + $0x10] sm:$0xff]  }
  0x10   : > { %v521_v4 = vunpack.c.l.bf16 %v520_v1  ;;  %v522_v5 = vunpack.c.h.bf16 %v520_v1  ;;  %v525_v6 = vunpack.c.l.bf16 %v583_v2  ;;  %v526_v7 = vunpack.c.h.bf16 %v583_v2  ;;  %v585_v8 = vld [vmem:[%s690_s19 + $0x18] sm:$0xff]   ;;  %v586_v30 = vld [vmem:[%s690_s19 + $0x20] sm:$0xff]   ;;  %v587_v31 = vld [vmem:[%s690_s19 + $0x28] sm:$0xff]  }
  0x11   : > { %v529_v10 = vunpack.c.l.bf16 %v584_v3  ;;  %v530_v11 = vunpack.c.h.bf16 %v584_v3  ;;  %v533_v12 = vunpack.c.l.bf16 %v585_v8  ;;  %v534_v13 = vunpack.c.h.bf16 %v585_v8  ;;  %v588_v36 = vld [vmem:[%s690_s19 + $0x30] sm:$0xff]   ;;  %v589_v37 = vld [vmem:[%s690_s19 + $0x38] sm:$0xff]   ;;  %v590_v3 = vld [vmem:[%s690_s19 + $0x40] sm:$0xff]  }
  0x12   : > { %v281_v14 = vmul.f32 %v521_v4, %v695_v0  ;;  %v282_v15 = vmul.f32 %v522_v5, %v695_v0  ;;  %v283_v16 = vmul.f32 %v525_v6, %v695_v0  ;;  %v284_v17 = vmul.f32 %v526_v7, %v695_v0  ;;  %v591_v4 = vld [vmem:[%s690_s19 + $0x48] sm:$0xff]  }
  0x13   : > { %v285_v18 = vmul.f32 %v529_v10, %v695_v0  ;;  %v286_v19 = vmul.f32 %v530_v11, %v695_v0  ;;  %v287_v20 = vmul.f32 %v533_v12, %v695_v0  ;;  %v288_v21 = vmul.f32 %v534_v13, %v695_v0  ;;  %v592_v10 = vld [vmem:[%s690_s19 + $0x50] sm:$0xff]   ;;  %v593_v11 = vld [vmem:[%s690_s19 + $0x58] sm:$0xff]  }
  0x14   : > { %v320_v22 = vadd.f32 %v704_v9, %v281_v14  ;;  %v321_v23 = vadd.f32 %v704_v9, %v282_v15  ;;  %v322_v24 = vadd.f32 %v704_v9, %v283_v16  ;;  %v323_v25 = vadd.f32 %v704_v9, %v284_v17 }
  0x15   : > { %v324_v26 = vadd.f32 %v704_v9, %v285_v18  ;;  %v325_v27 = vadd.f32 %v704_v9, %v286_v19  ;;  %v326_v28 = vadd.f32 %v704_v9, %v287_v20  ;;  %v327_v29 = vadd.f32 %v704_v9, %v288_v21 }
  0x16   : > { %v352_v32 = vmax.f32 %v320_v22, 0.0  ;;  %v353_v33 = vmax.f32 %v321_v23, 0.0  ;;  %v354_v34 = vmax.f32 %v322_v24, 0.0  ;;  %v355_v35 = vmax.f32 %v323_v25, 0.0 }
  0x17   : > { %v356_v38 = vmax.f32 %v324_v26, 0.0  ;;  %v357_v39 = vmax.f32 %v325_v27, 0.0  ;;  %v358_v40 = vmax.f32 %v326_v28, 0.0  ;;  %v359_v41 = vmax.f32 %v327_v29, 0.0 }
  0x18   : > { %385 = vst.msk [vmem:[%s722_s27] sm:$0xff] %vm384_vm0, %v352_v32  ;;  %386 = vst.msk [vmem:[%s722_s27 + $0x8] sm:$0xff] %vm384_vm0, %v353_v33  ;;  %v537_v42 = vunpack.c.l.bf16 %v586_v30  ;;  %v538_v43 = vunpack.c.h.bf16 %v586_v30  ;;  %v541_v44 = vunpack.c.l.bf16 %v587_v31  ;;  %v542_v45 = vunpack.c.h.bf16 %v587_v31 }
  0x19   : > { %387 = vst.msk [vmem:[%s722_s27 + $0x10] sm:$0xff] %vm384_vm0, %v354_v34  ;;  %388 = vst.msk [vmem:[%s722_s27 + $0x18] sm:$0xff] %vm384_vm0, %v355_v35  ;;  %v545_v46 = vunpack.c.l.bf16 %v588_v36  ;;  %v546_v47 = vunpack.c.h.bf16 %v588_v36  ;;  %v549_v48 = vunpack.c.l.bf16 %v589_v37  ;;  %v550_v49 = vunpack.c.h.bf16 %v589_v37 }
  0x1a   : > { %389 = vst.msk [vmem:[%s722_s27 + $0x20] sm:$0xff] %vm384_vm0, %v356_v38  ;;  %390 = vst.msk [vmem:[%s722_s27 + $0x28] sm:$0xff] %vm384_vm0, %v357_v39  ;;  %v289_v50 = vmul.f32 %v537_v42, %v695_v0  ;;  %v290_v51 = vmul.f32 %v538_v43, %v695_v0  ;;  %v291_v52 = vmul.f32 %v541_v44, %v695_v0  ;;  %v553_v16 = vunpack.c.l.bf16 %v590_v3 }
  0x1b   : > { %391 = vst.msk [vmem:[%s722_s27 + $0x30] sm:$0xff] %vm384_vm0, %v358_v40  ;;  %392 = vst.msk [vmem:[%s722_s27 + $0x38] sm:$0xff] %vm384_vm0, %v359_v41  ;;  %v292_v53 = vmul.f32 %v542_v45, %v695_v0  ;;  %v293_v54 = vmul.f32 %v545_v46, %v695_v0  ;;  %v294_v55 = vmul.f32 %v546_v47, %v695_v0  ;;  %v554_v17 = vunpack.c.h.bf16 %v590_v3  ;;  %v594_v40 = vld [vmem:[%s690_s19 + $0x60] sm:$0xff]   ;;  %v595_v41 = vld [vmem:[%s690_s19 + $0x68] sm:$0xff]  }
  0x1c   : > { %v295_v56 = vmul.f32 %v549_v48, %v695_v0  ;;  %v296_v57 = vmul.f32 %v550_v49, %v695_v0  ;;  %v328_v58 = vadd.f32 %v704_v9, %v289_v50  ;;  %v329_v59 = vadd.f32 %v704_v9, %v290_v51  ;;  %v596_v46 = vld [vmem:[%s690_s19 + $0x70] sm:$0xff]   ;;  %v597_v47 = vld [vmem:[%s690_s19 + $0x78] sm:$0xff]  }
  0x1d   : > { %v330_v60 = vadd.f32 %v704_v9, %v291_v52  ;;  %v331_v61 = vadd.f32 %v704_v9, %v292_v53  ;;  %v332_v62 = vadd.f32 %v704_v9, %v293_v54  ;;  %v333_v63 = vadd.f32 %v704_v9, %v294_v55 }
  0x1e   : > { %v334_v1 = vadd.f32 %v704_v9, %v295_v56  ;;  %v335_v2 = vadd.f32 %v704_v9, %v296_v57  ;;  %v360_v5 = vmax.f32 %v328_v58, 0.0  ;;  %v361_v6 = vmax.f32 %v329_v59, 0.0 }
  0x1f   : > { %v362_v7 = vmax.f32 %v330_v60, 0.0  ;;  %v363_v8 = vmax.f32 %v331_v61, 0.0  ;;  %v364_v12 = vmax.f32 %v332_v62, 0.0  ;;  %v365_v13 = vmax.f32 %v333_v63, 0.0 }
  0x20   : > { %v366_v14 = vmax.f32 %v334_v1, 0.0  ;;  %v367_v15 = vmax.f32 %v335_v2, 0.0  ;;  %393 = vst.msk [vmem:[%s722_s27 + $0x40] sm:$0xff] %vm384_vm0, %v360_v5  ;;  %394 = vst.msk [vmem:[%s722_s27 + $0x48] sm:$0xff] %vm384_vm0, %v361_v6  ;;  %v557_v18 = vunpack.c.l.bf16 %v591_v4  ;;  %v558_v19 = vunpack.c.h.bf16 %v591_v4 }
  0x21   : > { %395 = vst.msk [vmem:[%s722_s27 + $0x50] sm:$0xff] %vm384_vm0, %v362_v7  ;;  %396 = vst.msk [vmem:[%s722_s27 + $0x58] sm:$0xff] %vm384_vm0, %v363_v8  ;;  %v561_v20 = vunpack.c.l.bf16 %v592_v10  ;;  %v562_v21 = vunpack.c.h.bf16 %v592_v10  ;;  %v565_v22 = vunpack.c.l.bf16 %v593_v11  ;;  %v566_v23 = vunpack.c.h.bf16 %v593_v11 }
  0x22   : > { %397 = vst.msk [vmem:[%s722_s27 + $0x60] sm:$0xff] %vm384_vm0, %v364_v12  ;;  %398 = vst.msk [vmem:[%s722_s27 + $0x68] sm:$0xff] %vm384_vm0, %v365_v13  ;;  %v297_v24 = vmul.f32 %v553_v16, %v695_v0  ;;  %v298_v25 = vmul.f32 %v554_v17, %v695_v0  ;;  %v299_v26 = vmul.f32 %v557_v18, %v695_v0  ;;  %v569_v52 = vunpack.c.l.bf16 %v594_v40 }
  0x23   : > { %399 = vst.msk [vmem:[%s722_s27 + $0x70] sm:$0xff] %vm384_vm0, %v366_v14  ;;  %400 = vst.msk [vmem:[%s722_s27 + $0x78] sm:$0xff] %vm384_vm0, %v367_v15  ;;  %v300_v27 = vmul.f32 %v558_v19, %v695_v0  ;;  %v301_v28 = vmul.f32 %v561_v20, %v695_v0  ;;  %v302_v29 = vmul.f32 %v562_v21, %v695_v0  ;;  %v570_v53 = vunpack.c.h.bf16 %v594_v40 }
  0x24   : > { %v303_v30 = vmul.f32 %v565_v22, %v695_v0  ;;  %v304_v31 = vmul.f32 %v566_v23, %v695_v0  ;;  %v336_v32 = vadd.f32 %v704_v9, %v297_v24  ;;  %v337_v33 = vadd.f32 %v704_v9, %v298_v25 }
  0x25   : > { %v338_v34 = vadd.f32 %v704_v9, %v299_v26  ;;  %v339_v35 = vadd.f32 %v704_v9, %v300_v27  ;;  %v340_v36 = vadd.f32 %v704_v9, %v301_v28  ;;  %v341_v37 = vadd.f32 %v704_v9, %v302_v29 }
  0x26   : > { %v342_v38 = vadd.f32 %v704_v9, %v303_v30  ;;  %v343_v39 = vadd.f32 %v704_v9, %v304_v31  ;;  %v368_v42 = vmax.f32 %v336_v32, 0.0  ;;  %v369_v43 = vmax.f32 %v337_v33, 0.0 }
  0x27   : > { %v370_v44 = vmax.f32 %v338_v34, 0.0  ;;  %v371_v45 = vmax.f32 %v339_v35, 0.0  ;;  %v372_v48 = vmax.f32 %v340_v36, 0.0  ;;  %v373_v49 = vmax.f32 %v341_v37, 0.0 }
  0x28   : > { %v374_v50 = vmax.f32 %v342_v38, 0.0  ;;  %v375_v51 = vmax.f32 %v343_v39, 0.0  ;;  %401 = vst.msk [vmem:[%s722_s27 + $0x80] sm:$0xff] %vm384_vm0, %v368_v42  ;;  %402 = vst.msk [vmem:[%s722_s27 + $0x88] sm:$0xff] %vm384_vm0, %v369_v43  ;;  %v573_v54 = vunpack.c.l.bf16 %v595_v41  ;;  %v574_v55 = vunpack.c.h.bf16 %v595_v41 }
  0x29   : > { %403 = vst.msk [vmem:[%s722_s27 + $0x90] sm:$0xff] %vm384_vm0, %v370_v44  ;;  %404 = vst.msk [vmem:[%s722_s27 + $0x98] sm:$0xff] %vm384_vm0, %v371_v45  ;;  %v577_v56 = vunpack.c.l.bf16 %v596_v46  ;;  %v578_v57 = vunpack.c.h.bf16 %v596_v46  ;;  %v581_v58 = vunpack.c.l.bf16 %v597_v47  ;;  %v582_v59 = vunpack.c.h.bf16 %v597_v47 }
  0x2a   : > { %405 = vst.msk [vmem:[%s722_s27 + $0xa0] sm:$0xff] %vm384_vm0, %v372_v48  ;;  %406 = vst.msk [vmem:[%s722_s27 + $0xa8] sm:$0xff] %vm384_vm0, %v373_v49  ;;  %v305_v60 = vmul.f32 %v569_v52, %v695_v0  ;;  %v306_v61 = vmul.f32 %v570_v53, %v695_v0  ;;  %v307_v62 = vmul.f32 %v573_v54, %v695_v0 }
  0x2b   : > { %407 = vst.msk [vmem:[%s722_s27 + $0xb0] sm:$0xff] %vm384_vm0, %v374_v50  ;;  %408 = vst.msk [vmem:[%s722_s27 + $0xb8] sm:$0xff] %vm384_vm0, %v375_v51  ;;  %v308_v63 = vmul.f32 %v574_v55, %v695_v0  ;;  %v309_v1 = vmul.f32 %v577_v56, %v695_v0  ;;  %v310_v2 = vmul.f32 %v578_v57, %v695_v0 }
  0x2c   : > { %v311_v3 = vmul.f32 %v581_v58, %v695_v0  ;;  %v312_v4 = vmul.f32 %v582_v59, %v695_v0  ;;  %v344_v5 = vadd.f32 %v704_v9, %v305_v60  ;;  %v345_v6 = vadd.f32 %v704_v9, %v306_v61 }
  0x2d   : > { %v346_v7 = vadd.f32 %v704_v9, %v307_v62  ;;  %v347_v8 = vadd.f32 %v704_v9, %v308_v63  ;;  %v348_v10 = vadd.f32 %v704_v9, %v309_v1  ;;  %v349_v11 = vadd.f32 %v704_v9, %v310_v2 }
  0x2e   : > { %v350_v0 = vadd.f32 %v704_v9, %v311_v3  ;;  %v351_v12 = vadd.f32 %v704_v9, %v312_v4  ;;  %v376_v13 = vmax.f32 %v344_v5, 0.0  ;;  %v377_v14 = vmax.f32 %v345_v6, 0.0 }
  0x2f   : > { %v378_v15 = vmax.f32 %v346_v7, 0.0  ;;  %v379_v16 = vmax.f32 %v347_v8, 0.0  ;;  %v380_v17 = vmax.f32 %v348_v10, 0.0  ;;  %v381_v18 = vmax.f32 %v349_v11, 0.0 }
  0x30   : > { %v382_v19 = vmax.f32 %v350_v0, 0.0  ;;  %v383_v20 = vmax.f32 %v351_v12, 0.0  ;;  %409 = vst.msk [vmem:[%s722_s27 + $0xc0] sm:$0xff] %vm384_vm0, %v376_v13  ;;  %410 = vst.msk [vmem:[%s722_s27 + $0xc8] sm:$0xff] %vm384_vm0, %v377_v14 }
  0x31   : > { %411 = vst.msk [vmem:[%s722_s27 + $0xd0] sm:$0xff] %vm384_vm0, %v378_v15  ;;  %412 = vst.msk [vmem:[%s722_s27 + $0xd8] sm:$0xff] %vm384_vm0, %v379_v16 }
  0x32   : > { %413 = vst.msk [vmem:[%s722_s27 + $0xe0] sm:$0xff] %vm384_vm0, %v380_v17  ;;  %414 = vst.msk [vmem:[%s722_s27 + $0xe8] sm:$0xff] %vm384_vm0, %v381_v18 }
  0x33   : > { %415 = vst.msk [vmem:[%s722_s27 + $0xf0] sm:$0xff] %vm384_vm0, %v382_v19  ;;  %416 = vst.msk [vmem:[%s722_s27 + $0xf8] sm:$0xff] %vm384_vm0, %v383_v20 }
  0x34 PF: > { %s13_s14 = sadd.s32 1, %s644_s14   ;;  %s865_s12 = smov %s640_s13 }
  0x35   : > { %p10_p5 = scmp.ge.s32.totalorder %s13_s14, 4   ;;  %s866_s13 = smov %s868_s15 }
  0x37   :  { %12 = sbr.rel (!%p10_p5) target bundleno = 2 (0x2), region = 62 }

// kernel: basic_conv_forward.2
= control target key start
LH: loop header
LB: loop body
LE: loop exit
PB: predicated region body
PF: predicated region fallthrough
CT: control target
= control target key end

     0   :  { %s3289_s12 = smov 0   ;;  %s3291_s13 = smov 0   ;;  %s4722_s0 = inlined_call_operand.vmem [shape: bf16[2,16,16,4], index: 0, kind: input, shape index: {}]   ;;  %s4723_s1 = inlined_call_operand.vmem [shape: bf16[36,128], index: 1, kind: input, shape index: {}]   ;;  %s4724_s2 = inlined_call_operand.vmem [shape: bf16[2,256,128], index: 2, kind: output, shape index: {0}]   ;;  %s4725_s3 = inlined_call_operand.vmem [shape: f32[2,8,128], index: 3, kind: output, shape index: {1}]  }
   0x1   :  { %s3293_s14 = smov 0  }
   0x2 LB: > { %s26_s15 = sadd.s32 1, %s3252_s13  ;;  %p2791_p0 = scmp.ge.s32.totalorder %s3256_s14, 1  ;;  %s3256_s14 = sphi %s3293_s14, %s14_s14   ;;  %s3252_s13 = sphi %s3291_s13, %s4737_s13   ;;  %s3248_s12 = sphi %s3289_s12, %s4736_s12  }
   0x3   : > { %p28_p1 = scmp.ge.s32.totalorder %s26_s15, 2  ;;  %p154_p2 = scmp.lt.s32.totalorder %s3256_s14, 3 }
   0x5   : > { %s4739_s15 = smov (%p28_p1, %s26_s15), 0  ;;  %p155_p3 = pnand %p2791_p0, %p154_p2 }
   0x6   : > { %p186_p4 = scmp.lt.s32.totalorder (!%p155_p3), %s3248_s12, 1  ;;  %s3259_s20 = smov (!%p155_p3), 8  }
   0x7   : > { %158 = sbr.rel (%p155_p3) target bundleno = 884 (0x374), region = 28  ;;  %s3260_s21 = smov (!%p155_p3), 4  }
   0x8   : > { %s3261_s22 = smov (!%p155_p3), 12   ;;  %s3262_s23 = smov (!%p155_p3), 24  }
   0x9   : > { %s3263_s24 = smov (!%p155_p3), 20   ;;  %s3264_s25 = smov (!%p155_p3), 32  }
   0xa   : > { %s3265_s26 = smov (!%p155_p3), 16   ;;  %s3266_s27 = smov (!%p155_p3), 28  }
   0xc   : > { %vm210_vm0 = vcmask 27648   ;;  %vm213_vm1 = vcmask 24576   ;;  %v3258_v0 = vmov 0   ;;  %s4741_s12 = smov (!%p186_p4, %s3248_s12), 1  ;;  %vm1232_vm2 = vcmask 1042432  }
   0xd   : > { %211 = vst.msk [vmem:[#allocation2] sm:$0xf] %vm210_vm0, %v3258_v0  ;;  %212 = vst.msk [vmem:[#allocation2 + $0x4] sm:$0xf] %vm210_vm0, %v3258_v0  ;;  %vm1233_vm3 = vcmask 1046532   ;;  %s2922_s16 = sshll.u32 %s4741_s12, 7 }
   0xe   : > { %214 = vst.msk [vmem:[#allocation2 + $0x8] sm:$0x1] %vm213_vm1, %v3258_v0  ;;  %217 = vst.msk [vmem:[#allocation2 + $0x14] sm:$0x1] %vm213_vm1, %v3258_v0  ;;  %vm797_vm4 = vsmask.f32 3328  ;;  %s3373_s19 = scalar_lea.vmem %s4722_s0, %s2922_s16  ;;  %s4509_s9 = scalar_lea.vmem %s4724_s2, %s2922_s16 }
   0xf   : > { %215 = vst.msk [vmem:[#allocation2 + $0xc] sm:$0xf] %vm210_vm0, %v3258_v0  ;;  %216 = vst.msk [vmem:[#allocation2 + $0x10] sm:$0xf] %vm210_vm0, %v3258_v0  ;;  %vm798_vm5 = vsmask.f32 7440 }
  0x10   : > { %218 = vst.msk [vmem:[#allocation2 + $0x18] sm:$0xf] %vm210_vm0, %v3258_v0  ;;  %219 = vst.msk [vmem:[#allocation2 + $0x1c] sm:$0xf] %vm210_vm0, %v3258_v0  ;;  %vm298_vm6 = vsmask.f32 256 }
  0x11   : > { %220 = vst.msk [vmem:[#allocation2 + $0x20] sm:$0x1] %vm213_vm1, %v3258_v0  ;;  %223 = vst.msk [vmem:[#allocation2 + $0x2c] sm:$0x1] %vm213_vm1, %v3258_v0  ;;  %v268_v2 = vld [vmem:[%s3373_s19 + $0x8] sm:$0xf] }
  0x12   : > { %221 = vst.msk [vmem:[#allocation2 + $0x24] sm:$0xf] %vm210_vm0, %v3258_v0  ;;  %222 = vst.msk [vmem:[#allocation2 + $0x28] sm:$0xf] %vm210_vm0, %v3258_v0  ;;  %vm299_vm8 = vsmask.f32 4368 }
  0x13   : > { %224 = vst.msk [vmem:[#allocation2 + $0x30] sm:$0xf] %vm210_vm0, %v3258_v0  ;;  %225 = vst.msk [vmem:[#allocation2 + $0x34] sm:$0xf] %vm210_vm0, %v3258_v0  ;;  %vm623_vm9 = vsmask.f32 7938 }
  0x14   : > { %226 = vst.msk [vmem:[#allocation2 + $0x38] sm:$0x1] %vm213_vm1, %v3258_v0  ;;  %229 = vst.msk [vmem:[#allocation2 + $0x44] sm:$0x1] %vm213_vm1, %v3258_v0  ;;  %v3380_v3 = vld [vmem:[#allocation2] sm:$0xf] }
  0x15   : > { %227 = vst.msk [vmem:[#allocation2 + $0x3c] sm:$0xf] %vm210_vm0, %v3258_v0  ;;  %228 = vst.msk [vmem:[#allocation2 + $0x40] sm:$0xf] %vm210_vm0, %v3258_v0  ;;  %v3382_v4 = vld [vmem:[#allocation2 + $0x4] sm:$0xf] }
  0x16   : > { %230 = vst.msk [vmem:[#allocation2 + $0x48] sm:$0xf] %vm210_vm0, %v3258_v0  ;;  %231 = vst.msk [vmem:[#allocation2 + $0x4c] sm:$0xf] %vm210_vm0, %v3258_v0  ;;  %v745_v5 = vld [vmem:[#allocation2 + $0x8] sm:$0x1] }
  0x17   : > { %232 = vst.msk [vmem:[#allocation2 + $0x50] sm:$0x1] %vm213_vm1, %v3258_v0  ;;  %235 = vst.msk [vmem:[#allocation2 + $0x5c] sm:$0x1] %vm213_vm1, %v3258_v0  ;;  %v2797_v6 = vrot.slane %v3380_v3, 9  ;;  %v1237_v7 = vrot.slane %v3382_v4, 5 }
  0x18   : > { %233 = vst.msk [vmem:[#allocation2 + $0x54] sm:$0xf] %vm210_vm0, %v3258_v0  ;;  %234 = vst.msk [vmem:[#allocation2 + $0x58] sm:$0xf] %vm210_vm0, %v3258_v0  ;;  %v1240_v8 = vrot.slane %v745_v5, 5  ;;  %v801_v9 = vshrl.u32 %v3380_v3, 16 }
  0x19   : > { %236 = vst.msk [vmem:[#allocation2 + $0x60] sm:$0xf] %vm210_vm0, %v3258_v0  ;;  %237 = vst.msk [vmem:[#allocation2 + $0x64] sm:$0xf] %vm210_vm0, %v3258_v0  ;;  %v804_v10 = vshll.u32 %v3380_v3, 16  ;;  %v810_v11 = vshll.u32 %v3382_v4, 16 }
  0x1a   : > { %238 = vst.msk [vmem:[#allocation2 + $0x68] sm:$0x1] %vm213_vm1, %v3258_v0  ;;  %241 = vst.msk [vmem:[#allocation2 + $0x74] sm:$0x1] %vm213_vm1, %v3258_v0  ;;  %v814_v12 = vshrl.u32 %v3382_v4, 16  ;;  %v820_v13 = vshll.u32 %v745_v5, 16 }
  0x1b   : > { %239 = vst.msk [vmem:[#allocation2 + $0x6c] sm:$0xf] %vm210_vm0, %v3258_v0  ;;  %240 = vst.msk [vmem:[#allocation2 + $0x70] sm:$0xf] %vm210_vm0, %v3258_v0  ;;  %v269_v14 = vld [vmem:[%s3373_s19 + $0xc] sm:$0xf] }
  0x1c   : > { %242 = vst.msk [vmem:[#allocation2 + $0x78] sm:$0xf] %vm210_vm0, %v3258_v0  ;;  %243 = vst.msk [vmem:[#allocation2 + $0x7c] sm:$0xf] %vm210_vm0, %v3258_v0  ;;  %v1239_v16 = vrot.slane %v1237_v7, 4  ;;  %v803_v17 = vrot.slane %v801_v9, 4 }
  0x1d   : > { %244 = vst.msk [vmem:[#allocation2 + $0x80] sm:$0x1] %vm213_vm1, %v3258_v0  ;;  %247 = vst.msk [vmem:[#allocation2 + $0x8c] sm:$0x1] %vm213_vm1, %v3258_v0  ;;  %v319_v18 = vshrl.u32 %v268_v2, 16  ;;  %v806_v19 = vrot.slane %v804_v10, 5 }
  0x1e   : > { %245 = vst.msk [vmem:[#allocation2 + $0x84] sm:$0xf] %vm210_vm0, %v3258_v0  ;;  %246 = vst.msk [vmem:[#allocation2 + $0x88] sm:$0xf] %vm210_vm0, %v3258_v0  ;;  %v812_v20 = vrot.slane %v810_v11, 5  ;;  %v816_v21 = vrot.slane %v814_v12, 4 }
  0x1f   : > { %248 = vst.msk [vmem:[#allocation2 + $0x90] sm:$0xf] %vm210_vm0, %v3258_v0  ;;  %249 = vst.msk [vmem:[#allocation2 + $0x94] sm:$0xf] %vm210_vm0, %v3258_v0  ;;  %v822_v22 = vrot.slane %v820_v13, 5  ;;  %v321_v25 = vrot.slane %v319_v18, 7  ;;  %v807_v30 = vor.u32 %v806_v19, %v803_v17 }
  0x20   : > { %250 = vst.msk [vmem:[#allocation2 + $0x98] sm:$0x1] %vm213_vm1, %v3258_v0  ;;  %253 = vst.msk [vmem:[#allocation2 + $0xa4] sm:$0x1] %vm213_vm1, %v3258_v0  ;;  %v266_v23 = vld [vmem:[%s3373_s19] sm:$0xf]  ;;  %v817_v31 = vor.u32 %v816_v21, %v812_v20 }
  0x21   : > { %251 = vst.msk [vmem:[#allocation2 + $0x9c] sm:$0xf] %vm210_vm0, %v3258_v0  ;;  %252 = vst.msk [vmem:[#allocation2 + $0xa0] sm:$0xf] %vm210_vm0, %v3258_v0  ;;  %v322_v26 = vshll.u32 %v268_v2, 16  ;;  %v327_v27 = vshrl.u32 %v269_v14, 16 }
  0x22   : > { %254 = vst.msk [vmem:[#allocation2 + $0xa8] sm:$0xf] %vm210_vm0, %v3258_v0  ;;  %255 = vst.msk [vmem:[#allocation2 + $0xac] sm:$0xf] %vm210_vm0, %v3258_v0  ;;  %v267_v28 = vld [vmem:[%s3373_s19 + $0x4] sm:$0xf] }
  0x23   : > { %256 = vst.msk [vmem:[#allocation2 + $0xb0] sm:$0x1] %vm213_vm1, %v3258_v0  ;;  %259 = vst.msk [vmem:[#allocation2 + $0xbc] sm:$0x1] %vm213_vm1, %v3258_v0  ;;  %v330_v32 = vshll.u32 %v269_v14, 16  ;;  %v324_v36 = vor.u32 %v322_v26, %v321_v25  ;;  %v325_v37 = vrot.slane %v321_v25, 4 }
  0x24   : > { %257 = vst.msk [vmem:[#allocation2 + $0xb4] sm:$0xf] %vm210_vm0, %v3258_v0  ;;  %258 = vst.msk [vmem:[#allocation2 + $0xb8] sm:$0xf] %vm210_vm0, %v3258_v0  ;;  %v634_v34 = vld [vmem:[#allocation2 + $0x18] sm:$0xf] }
  0x25   : > { %260 = vst.msk [vmem:[#allocation2 + $0xc0] sm:$0xf] %vm210_vm0, %v3258_v0  ;;  %261 = vst.msk [vmem:[#allocation2 + $0xc4] sm:$0xf] %vm210_vm0, %v3258_v0  ;;  %v329_v38 = vrot.slane %v327_v27, 7  ;;  %v302_v39 = vshrl.u32 %v266_v23, 16 }
  0x26   : > { %262 = vst.msk [vmem:[#allocation2 + $0xc8] sm:$0x1] %vm213_vm1, %v3258_v0  ;;  %265 = vst.msk [vmem:[#allocation2 + $0xd4] sm:$0x1] %vm213_vm1, %v3258_v0  ;;  %v270_v40 = vld [vmem:[%s3373_s19 + $0x10] sm:$0xf] }
  0x27   : > { %263 = vst.msk [vmem:[#allocation2 + $0xcc] sm:$0xf] %vm210_vm0, %v3258_v0  ;;  %264 = vst.msk [vmem:[#allocation2 + $0xd0] sm:$0xf] %vm210_vm0, %v3258_v0  ;;  %v808_v41 = vrot.slane %v807_v30, 4  ;;  %v818_v42 = vrot.slane %v817_v31, 4  ;;  %v332_v46 = vor.u32 %v330_v32, %v329_v38 }
  0x28   : > { %vm3375_vm7 = vmor %vm1232_vm2, %vm1233_vm3  ;;  %v305_v44 = vshll.u32 %v266_v23, 16  ;;  %v310_v45 = vshrl.u32 %v267_v28, 16  ;;  %v304_v48 = vrot.slane %v302_v39, 7  ;;  %v313_v49 = vshll.u32 %v267_v28, 16  ;;  %v271_v50 = vld [vmem:[%s3373_s19 + $0x14] sm:$0xf] }
  0x29   : > { %v1238_v15 = vsel %vm3375_vm7, %v2797_v6, %v1237_v7  ;;  %v1241_v24 = vsel %vm3375_vm7, %v1239_v16, %v1240_v8  ;;  %vm3399_vm10 = vmand %vm210_vm0, %vm623_vm9  ;;  %v625_v54 = vld [vmem:[#allocation2 + $0xc] sm:$0xf]  ;;  %v336_v55 = vshrl.u32 %v270_v40, 16  ;;  %v641_v60 = vld [vmem:[#allocation2 + $0x24] sm:$0xf]  ;;  %v339_v5 = vshll.u32 %v270_v40, 16 }
  0x2a   : > { %v2847_v29 = vcombine.low %v1238_v15, %v1241_v24  ;;  %vm3405_vm11 = vmor %vm797_vm4, %vm798_vm5  ;;  %v635_v47 = vsel %vm3399_vm10, %v324_v36, %v634_v34  ;;  %v312_v53 = vrot.slane %v310_v45, 7  ;;  %v307_v58 = vor.u32 %v305_v44, %v304_v48  ;;  %v631_v61 = vld [vmem:[#allocation2 + $0x14] sm:$0x1]  ;;  %v638_v62 = vld [vmem:[#allocation2 + $0x20] sm:$0x1]  ;;  %s2796_s10 = sshll.u32 %s4741_s12, 3 }
  0x2b   : > { %vm3413_vm12 = vmor %vm298_vm6, %vm299_vm8  ;;  %v813_v51 = vsel %vm3405_vm11, %v808_v41, %v812_v20  ;;  %v823_v52 = vsel %vm3405_vm11, %v818_v42, %v822_v22  ;;  %636 = vst [vmem:[#allocation2 + $0x18] sm:$0xf] %v635_v47  ;;  %v308_v59 = vrot.slane %v304_v48, 4  ;;  %v338_v2 = vrot.slane %v336_v55, 7  ;;  %v272_v7 = vld [vmem:[%s3373_s19 + $0x18] sm:$0xf]  ;;  %s204_s17 = scalar_lea.vmem %s4725_s3, %s2796_s10 }
  0x2c   : > { %1591 = vrot.lane.b32.xlu1 %v2847_v29, %s3259_s20  ;;  %v2831_v56 = vcombine.low %v813_v51, %v823_v52  ;;  %v333_v57 = vsel %vm3413_vm12, %v325_v37, %v332_v46  ;;  %vm3428_vm13 = vmand %vm213_vm1, %vm298_vm6  ;;  %v315_v0 = vor.u32 %v313_v49, %v312_v53  ;;  %v344_v6 = vshrl.u32 %v271_v50, 16  ;;  %v273_v12 = vld [vmem:[%s3373_s19 + $0x1c] sm:$0xf]  ;;  %v645_v24 = vld [vmem:[#allocation2 + $0x2c] sm:$0x1] }
  0x2d   : > { %637 = vst.msk [vmem:[#allocation2 + $0x1c] sm:$0xf] %vm210_vm0, %v333_v57  ;;  %v626_v8 = vsel %vm3399_vm10, %v307_v58, %v625_v54  ;;  %v347_v9 = vshll.u32 %v271_v50, 16  ;;  %v317_v10 = vrot.slane %v312_v53, 4  ;;  %v334_v11 = vrot.slane %v329_v38, 4 }
  0x2e   : > { %1511 = vrot.lane.b32.xlu0 %v2831_v56, %s3260_s21  ;;  %v316_v13 = vsel %vm3413_vm12, %v308_v59, %v315_v0  ;;  %627 = vst [vmem:[#allocation2 + $0xc] sm:$0xf] %v626_v8  ;;  %v341_v14 = vor.u32 %v339_v5, %v338_v2  ;;  %v342_v15 = vrot.slane %v338_v2, 4  ;;  %v346_v16 = vrot.slane %v344_v6, 7  ;;  %v648_v32 = vld [vmem:[#allocation2 + $0x30] sm:$0xf] }
  0x2f   : > { %628 = vst.msk [vmem:[#allocation2 + $0x10] sm:$0xf] %vm210_vm0, %v316_v13  ;;  %v632_v17 = vsel %vm3428_vm13, %v317_v10, %v631_v61  ;;  %v639_v18 = vsel %vm3428_vm13, %v334_v11, %v638_v62  ;;  %v353_v19 = vshrl.u32 %v272_v7, 16  ;;  %v356_v20 = vshll.u32 %v272_v7, 16 }
  0x30   : > { %v349_v21 = vor.u32 %v347_v9, %v346_v16  ;;  %v642_v22 = vsel %vm3399_vm10, %v341_v14, %v641_v60  ;;  %633 = vst [vmem:[#allocation2 + $0x14] sm:$0x1] %v632_v17  ;;  %640 = vst [vmem:[#allocation2 + $0x20] sm:$0x1] %v639_v18  ;;  %v351_v23 = vrot.slane %v346_v16, 4  ;;  %v361_v25 = vshrl.u32 %v273_v12, 16 }
  0x31   : > { %643 = vst [vmem:[#allocation2 + $0x24] sm:$0xf] %v642_v22  ;;  %v3447_v27 = vrot.slane %v353_v19, 7  ;;  %v364_v31 = vshll.u32 %v273_v12, 16  ;;  %vm2166_vm14 = vcmask 1041408   ;;  %vm1833_vm15 = vcmask 31744  }
  0x32   : > { %v749_v26 = vld [vmem:[#allocation2 + $0x18] sm:$0xf]  ;;  %v350_v30 = vsel %vm3413_vm12, %v342_v15, %v349_v21  ;;  %v646_v36 = vsel %vm3428_vm13, %v351_v23, %v645_v24  ;;  %v3455_v38 = vrot.slane %v361_v25, 7  ;;  %vm1915_vm1 = vcmask 97280  }
  0x33   : > { %v849_v28 = vshrl.u32 %v749_v26, 16  ;;  %v852_v29 = vshll.u32 %v749_v26, 16  ;;  %644 = vst.msk [vmem:[#allocation2 + $0x28] sm:$0xf] %vm210_vm0, %v350_v30  ;;  %v358_v37 = vor.u32 %v356_v20, %v3447_v27  ;;  %v2799_v40 = vrot.slane %v749_v26, 9 }
  0x34   : > { %v750_v34 = vld [vmem:[#allocation2 + $0x1c] sm:$0xf]  ;;  %647 = vst [vmem:[#allocation2 + $0x2c] sm:$0x1] %v646_v36  ;;  %v359_v47 = vrot.slane %v3447_v27, 4  ;;  %v3467_v53 = vor.u32 %v364_v31, %v3455_v38  ;;  %vm1948_vm2 = vcmask 130048  }
  0x35   : > { %v3457_v39 = vcombine.low %v749_v26, %v750_v34  ;;  %v1251_v41 = vrot.slane %v750_v34, 5  ;;  %v851_v42 = vrot.slane %v849_v28, 4  ;;  %v746_v44 = vld [vmem:[#allocation2 + $0xc] sm:$0xf]  ;;  %v854_v45 = vrot.slane %v852_v29, 5 }
  0x36   : > { %v858_v46 = vshll.u32 %v750_v34, 16  ;;  %v649_v48 = vsel %vm3399_vm10, %v358_v37, %v648_v32  ;;  %v862_v49 = vshrl.u32 %v750_v34, 16  ;;  %v3464_v50 = vld [vmem:[#allocation2 + $0x10] sm:$0xf]  ;;  %v825_v51 = vshrl.u32 %v746_v44, 16 }
  0x37   : > { %1628 = vrot.lane.b32.xlu1 %v3457_v39, %s3261_s22  ;;  %v2798_v52 = vrot.slane %v746_v44, 9  ;;  %650 = vst [vmem:[#allocation2 + $0x30] sm:$0xf] %v649_v48  ;;  %v3470_v54 = vcombine.low %v746_v44, %v3464_v50  ;;  %v828_v55 = vshll.u32 %v746_v44, 16  ;;  %v3472_v56 = vld [vmem:[#allocation2 + $0x14] sm:$0x1]  ;;  %v855_v59 = vor.u32 %v854_v45, %v851_v42 }
  0x38   : > { %v1244_v57 = vrot.slane %v3464_v50, 5  ;;  %v751_v58 = vld [vmem:[#allocation2 + $0x20] sm:$0x1]  ;;  %v752_v60 = vld [vmem:[#allocation2 + $0x24] sm:$0xf]  ;;  %v1247_v61 = vrot.slane %v3472_v56, 5  ;;  %v1252_v11 = vsel %vm3375_vm7, %v2799_v40, %v1251_v41 }
  0x39   : > { %v1253_v62 = vrot.slane %v1251_v41, 4  ;;  %v1254_v0 = vrot.slane %v751_v58, 5  ;;  %v3476_v2 = vrot.slane %v858_v46, 5  ;;  %1626 = vrot.lane.b32.xlu0 %v3470_v54, %s3261_s22  ;;  %v873_v5 = vshrl.u32 %v752_v60, 16  ;;  %v274_v45 = vld [vmem:[%s3373_s19 + $0x20] sm:$0xf] }
  0x3a   : > { %v876_v6 = vshll.u32 %v752_v60, 16  ;;  %v1245_v7 = vsel %vm3375_vm7, %v2798_v52, %v1244_v57  ;;  %v1246_v8 = vrot.slane %v1244_v57, 4  ;;  %v838_v9 = vshrl.u32 %v3464_v50, 16  ;;  %v753_v10 = vld [vmem:[#allocation2 + $0x28] sm:$0xf] }
  0x3b   : > { %v1255_v12 = vsel %vm3375_vm7, %v1253_v62, %v1254_v0  ;;  %v864_v13 = vrot.slane %v862_v49, 4  ;;  %v886_v14 = vshrl.u32 %v753_v10, 16  ;;  %v3487_v15 = vcombine.low %v752_v60, %v753_v10  ;;  %v754_v17 = vld [vmem:[#allocation2 + $0x2c] sm:$0x1]  ;;  %v652_v62 = vld [vmem:[#allocation2 + $0x38] sm:$0x1] }
  0x3c   : > { %v1248_v16 = vsel %vm3375_vm7, %v1246_v8, %v1247_v61  ;;  %v2800_v18 = vrot.slane %v752_v60, 9  ;;  %v1258_v20 = vrot.slane %v753_v10, 5  ;;  %v1261_v21 = vrot.slane %v754_v17, 5  ;;  %v276_v8 = vld [vmem:[%s3373_s19 + $0x28] sm:$0xf] }
  0x3d   : > { %v2848_v19 = vcombine.low %v1245_v7, %v1248_v16  ;;  %v856_v22 = vrot.slane %v855_v59, 4  ;;  %1733 = vrot.lane.b32.xlu1 %v3487_v15, %s3262_s23  ;;  %1731 = vrot.lane.b32.xlu0 %v3457_v39, %s3262_s23  ;;  %v865_v23 = vor.u32 %v864_v13, %v3476_v2  ;;  %v868_v24 = vshll.u32 %v751_v58, 16 }
  0x3e   : > { %v875_v25 = vrot.slane %v873_v5, 4  ;;  %v878_v26 = vrot.slane %v876_v6, 5  ;;  %v3496_v28 = vcombine.low %v1252_v11, %v1255_v12  ;;  %v1260_v29 = vrot.slane %v1258_v20, 4  ;;  %v3518_v7 = vld [vmem:[#allocation2 + $0x30] sm:$0xf] }
  0x3f   : > { %v882_v30 = vshll.u32 %v753_v10, 16  ;;  %v888_v31 = vrot.slane %v886_v14, 4  ;;  %v866_v32 = vrot.slane %v865_v23, 4  ;;  %v870_v34 = vrot.slane %v868_v24, 5 }
  0x40   : > { %v879_v36 = vor.u32 %v878_v26, %v875_v25  ;;  %v892_v37 = vshll.u32 %v754_v17, 16  ;;  %v861_v40 = vsel %vm3405_vm11, %v856_v22, %v3476_v2  ;;  %v827_v42 = vrot.slane %v825_v51, 4  ;;  %v655_v17 = vld [vmem:[#allocation2 + $0x3c] sm:$0xf] }
  0x41   : > { %v884_v41 = vrot.slane %v882_v30, 5  ;;  %v830_v44 = vrot.slane %v828_v55, 5  ;;  %1696 = vrot.lane.b32.xlu0 %v2848_v19, %s3263_s24  ;;  %1593 = vrot.lane.b32.xlu1 %v2848_v19, %s3259_s20  ;;  %v1259_v46 = vsel %vm3375_vm7, %v2800_v18, %v1258_v20  ;;  %v1262_v48 = vsel %vm3375_vm7, %v1260_v29, %v1261_v21  ;;  %v277_v21 = vld [vmem:[%s3373_s19 + $0x2c] sm:$0xf] }
  0x42   : > { %v871_v49 = vsel %vm3405_vm11, %v866_v32, %v870_v34  ;;  %v880_v52 = vrot.slane %v879_v36, 4  ;;  %v894_v58 = vrot.slane %v892_v37, 5  ;;  %v834_v55 = vshll.u32 %v3464_v50, 16 }
  0x43   : > { %v889_v57 = vor.u32 %v888_v31, %v884_v41  ;;  %v831_v51 = vor.u32 %v830_v44, %v827_v42  ;;  %v840_v59 = vrot.slane %v838_v9, 4  ;;  %v844_v60 = vshll.u32 %v3472_v56, 16 }
  0x44   : > { %v367_v61 = vsel %vm3413_vm12, %v359_v47, %v3467_v53  ;;  %v370_v0 = vshrl.u32 %v274_v45, 16  ;;  %v836_v6 = vrot.slane %v834_v55, 5  ;;  %v3524_v27 = vcombine.low %v1259_v46, %v1262_v48  ;;  %v275_v53 = vld [vmem:[%s3373_s19 + $0x24] sm:$0xf]  ;;  %v662_v48 = vld [vmem:[#allocation2 + $0x48] sm:$0xf] }
  0x45   : > { %v890_v2 = vrot.slane %v889_v57, 4  ;;  %v832_v5 = vrot.slane %v831_v51, 4  ;;  %651 = vst.msk [vmem:[#allocation2 + $0x34] sm:$0xf] %vm210_vm0, %v367_v61  ;;  %1801 = vrot.lane.b32.xlu0 %v3496_v28, %s3264_s25  ;;  %1698 = vrot.lane.b32.xlu1 %v3496_v28, %s3263_s24  ;;  %v3526_v47 = vcombine.low %v861_v40, %v871_v49  ;;  %v368_v50 = vrot.slane %v3455_v38, 4 }
  0x46   : > { %v373_v56 = vshll.u32 %v274_v45, 16  ;;  %v885_v9 = vsel %vm3405_vm11, %v880_v52, %v884_v41  ;;  %v841_v11 = vor.u32 %v840_v59, %v836_v6  ;;  %v846_v12 = vrot.slane %v844_v60, 5  ;;  %v659_v40 = vld [vmem:[#allocation2 + $0x44] sm:$0x1]  ;;  %v278_v60 = vld [vmem:[%s3373_s19 + $0x30] sm:$0xf] }
  0x47   : > { %v895_v10 = vsel %vm3405_vm11, %v890_v2, %v894_v58  ;;  %v897_v13 = vshrl.u32 %v3518_v7, 16  ;;  %v900_v14 = vshll.u32 %v3518_v7, 16  ;;  %v653_v16 = vsel %vm3428_vm13, %v368_v50, %v652_v62 }
  0x48   : > { %v372_v38 = vrot.slane %v370_v0, 7  ;;  %v837_v18 = vsel %vm3405_vm11, %v832_v5, %v836_v6  ;;  %v842_v19 = vrot.slane %v841_v11, 4  ;;  %654 = vst [vmem:[#allocation2 + $0x38] sm:$0x1] %v653_v16  ;;  %v378_v20 = vshrl.u32 %v275_v53, 16 }
  0x49   : > { %v387_v22 = vshrl.u32 %v276_v8, 16  ;;  %1803 = vrot.lane.b32.xlu0 %v3524_v27, %s3264_s25  ;;  %1663 = vrot.lane.b32.xlu1 %v3526_v47, %s3265_s26  ;;  %v3546_v23 = vcombine.low %v885_v9, %v895_v10  ;;  %v381_v25 = vshll.u32 %v275_v53, 16  ;;  %v390_v26 = vshll.u32 %v276_v8, 16  ;;  %v279_v10 = vld [vmem:[%s3373_s19 + $0x34] sm:$0xf] }
  0x4a   : > { %v375_v24 = vor.u32 %v373_v56, %v372_v38  ;;  %v847_v29 = vsel %vm3405_vm11, %v842_v19, %v846_v12  ;;  %v380_v30 = vrot.slane %v378_v20, 7  ;;  %v376_v36 = vrot.slane %v372_v38, 4  ;;  %v666_v56 = vld [vmem:[#allocation2 + $0x50] sm:$0x1]  ;;  %v669_v19 = vld [vmem:[#allocation2 + $0x54] sm:$0xf] }
  0x4b   : > { %v389_v31 = vrot.slane %v387_v22, 7  ;;  %v2832_v32 = vcombine.low %v837_v18, %v847_v29  ;;  %v395_v41 = vshrl.u32 %v277_v21, 16  ;;  %v899_v44 = vrot.slane %v897_v13, 4 }
  0x4c   : > { %v3550_v34 = vld [vmem:[#allocation2 + $0x34] sm:$0xf]  ;;  %v656_v37 = vsel %vm3399_vm10, %v375_v24, %v655_v17  ;;  %v902_v45 = vrot.slane %v900_v14, 5  ;;  %v383_v49 = vor.u32 %v381_v25, %v380_v30  ;;  %v385_v52 = vrot.slane %v380_v30, 4 }
  0x4d   : > { %v910_v42 = vshrl.u32 %v3550_v34, 16  ;;  %v906_v46 = vshll.u32 %v3550_v34, 16  ;;  %657 = vst [vmem:[#allocation2 + $0x3c] sm:$0xf] %v656_v37  ;;  %1768 = vrot.lane.b32.xlu1 %v3546_v23, %s3266_s27  ;;  %1513 = vrot.lane.b32.xlu0 %v2832_v32, %s3260_s21  ;;  %v392_v57 = vor.u32 %v390_v26, %v389_v31  ;;  %v398_v58 = vshll.u32 %v277_v21, 16 }
  0x4e   : > { %v393_v59 = vrot.slane %v389_v31, 4  ;;  %v384_v62 = vsel %vm3413_vm12, %v376_v36, %v383_v49  ;;  %v660_v0 = vsel %vm3428_vm13, %v385_v52, %v659_v40  ;;  %v397_v2 = vrot.slane %v395_v41, 7 }
  0x4f   : > { %v3559_v51 = vrot.slane %v906_v46, 5  ;;  %v912_v55 = vrot.slane %v910_v42, 4  ;;  %v3562_v61 = vld [vmem:[#allocation2 + $0x38] sm:$0x1]  ;;  %v663_v5 = vsel %vm3399_vm10, %v392_v57, %v662_v48  ;;  %v903_v6 = vor.u32 %v902_v45, %v899_v44  ;;  %658 = vst.msk [vmem:[#allocation2 + $0x40] sm:$0xf] %vm210_vm0, %v384_v62 }
  0x50   : > { %v916_v53 = vshll.u32 %v3562_v61, 16  ;;  %661 = vst [vmem:[#allocation2 + $0x44] sm:$0x1] %v660_v0  ;;  %664 = vst [vmem:[#allocation2 + $0x48] sm:$0xf] %v663_v5  ;;  %v400_v8 = vor.u32 %v398_v58, %v397_v2  ;;  %v402_v9 = vrot.slane %v397_v2, 4  ;;  %v3593_v29 = vcombine.low %v3518_v7, %v3550_v34 }
  0x51   : > { %v913_v50 = vor.u32 %v912_v55, %v3559_v51  ;;  %1515 = vrot.lane.b32.xlu1 %v3526_v47, %s3260_s21  ;;  %1661 = vrot.lane.b32.xlu0 %v2832_v32, %s3265_s26  ;;  %v404_v11 = vshrl.u32 %v278_v60, 16  ;;  %v407_v12 = vshll.u32 %v278_v60, 16  ;;  %v904_v17 = vrot.slane %v903_v6, 4  ;;  %v280_v55 = vld [vmem:[%s3373_s19 + $0x38] sm:$0xf] }
  0x52   : > { %v401_v14 = vsel %vm3413_vm12, %v393_v59, %v400_v8  ;;  %v667_v16 = vsel %vm3428_vm13, %v402_v9, %v666_v56  ;;  %v412_v18 = vshrl.u32 %v279_v10, 16  ;;  %v918_v21 = vrot.slane %v916_v53, 5  ;;  %v673_v6 = vld [vmem:[#allocation2 + $0x5c] sm:$0x1] }
  0x53   : > { %v406_v38 = vrot.slane %v404_v11, 7  ;;  %665 = vst.msk [vmem:[#allocation2 + $0x4c] sm:$0xf] %vm210_vm0, %v401_v14  ;;  %668 = vst [vmem:[#allocation2 + $0x50] sm:$0x1] %v667_v16  ;;  %v914_v20 = vrot.slane %v913_v50, 4  ;;  %v2815_v32 = vcombine.low %v3380_v3, %v3382_v4 }
  0x54   : > { %v3577_v13 = vld [vmem:[#allocation2 + $0x3c] sm:$0xf]  ;;  %v1265_v22 = vrot.slane %v3550_v34, 5  ;;  %v2801_v30 = vrot.slane %v3518_v7, 9  ;;  %v414_v40 = vrot.slane %v412_v18, 7  ;;  %v415_v41 = vshll.u32 %v279_v10, 16 }
  0x55   : > { %1517 = vrot.lane.b32.xlu1 %v3546_v23, %s3260_s21  ;;  %1766 = vrot.lane.b32.xlu0 %v3526_v47, %s3266_s27  ;;  %v409_v24 = vor.u32 %v407_v12, %v406_v38  ;;  %v921_v25 = vshrl.u32 %v3577_v13, 16  ;;  %v924_v26 = vshll.u32 %v3577_v13, 16  ;;  %v909_v7 = vsel %vm3405_vm11, %v904_v17, %v3559_v51  ;;  %v281_v9 = vld [vmem:[%s3373_s19 + $0x3c] sm:$0xf] }
  0x56   : > { %v3596_v31 = vld [vmem:[#allocation2 + $0x40] sm:$0xf]  ;;  %v919_v34 = vsel %vm3405_vm11, %v914_v20, %v918_v21  ;;  %v1267_v42 = vrot.slane %v1265_v22, 4  ;;  %v1268_v44 = vrot.slane %v3562_v61, 5  ;;  %v410_v57 = vrot.slane %v406_v38, 4 }
  0x57   : > { %v670_v47 = vsel %vm3399_vm10, %v409_v24, %v669_v19  ;;  %v934_v36 = vshrl.u32 %v3596_v31, 16  ;;  %v930_v37 = vshll.u32 %v3596_v31, 16  ;;  %v923_v45 = vrot.slane %v921_v25, 4  ;;  %v3614_v52 = vld [vmem:[#allocation2 + $0x44] sm:$0x1] }
  0x58   : > { %671 = vst [vmem:[#allocation2 + $0x54] sm:$0xf] %v670_v47  ;;  %v926_v46 = vrot.slane %v924_v26, 5  ;;  %v417_v58 = vor.u32 %v415_v41, %v414_v40  ;;  %v1266_v51 = vsel %vm3375_vm7, %v2801_v30, %v1265_v22  ;;  %v1269_v59 = vsel %vm3375_vm7, %v1267_v42, %v1268_v44  ;;  %v3639_v12 = vld [vmem:[#allocation2 + $0x48] sm:$0xf] }
  0x59   : > { %1597 = vrot.lane.b32.xlu1 %v3524_v27, %s3259_s20  ;;  %1595 = vrot.lane.b32.xlu0 %v3496_v28, %s3259_s20  ;;  %v932_v48 = vrot.slane %v930_v37, 5  ;;  %v936_v49 = vrot.slane %v934_v36, 4  ;;  %v3621_v28 = vcombine.low %v909_v7, %v919_v34  ;;  %v940_v62 = vshll.u32 %v3614_v52, 16  ;;  %v283_v24 = vld [vmem:[%s3373_s19 + $0x44] sm:$0xf] }
  0x5a   : > { %v927_v60 = vor.u32 %v926_v46, %v923_v45  ;;  %v421_v0 = vshrl.u32 %v280_v55, 16  ;;  %v418_v2 = vsel %vm3413_vm12, %v410_v57, %v417_v58  ;;  %v3634_v5 = vcombine.low %v1266_v51, %v1269_v59  ;;  %v3658_v21 = vld [vmem:[#allocation2 + $0x4c] sm:$0xf]  ;;  %v676_v30 = vld [vmem:[#allocation2 + $0x60] sm:$0xf] }
  0x5b   : > { %v937_v61 = vor.u32 %v936_v49, %v932_v48  ;;  %672 = vst.msk [vmem:[#allocation2 + $0x58] sm:$0xf] %vm210_vm0, %v418_v2  ;;  %v942_v56 = vrot.slane %v940_v62, 5  ;;  %v419_v8 = vrot.slane %v414_v40, 4  ;;  %v1272_v11 = vrot.slane %v3596_v31, 5 }
  0x5c   : > { %v928_v50 = vrot.slane %v927_v60, 4  ;;  %v423_v10 = vrot.slane %v421_v0, 7  ;;  %v3650_v16 = vcombine.low %v3577_v13, %v3596_v31  ;;  %v2802_v38 = vrot.slane %v3577_v13, 9  ;;  %v680_v42 = vld [vmem:[#allocation2 + $0x68] sm:$0x1] }
  0x5d   : > { %1632 = vrot.lane.b32.xlu1 %v3593_v29, %s3261_s22  ;;  %1630 = vrot.lane.b32.xlu0 %v3487_v15, %s3261_s22  ;;  %v938_v53 = vrot.slane %v937_v61, 4  ;;  %v674_v14 = vsel %vm3428_vm13, %v419_v8, %v673_v6  ;;  %v1275_v17 = vrot.slane %v3614_v52, 5  ;;  %v424_v18 = vshll.u32 %v280_v55, 16  ;;  %v683_v58 = vld [vmem:[#allocation2 + $0x6c] sm:$0xf] }
  0x5e   : > { %675 = vst [vmem:[#allocation2 + $0x5c] sm:$0x1] %v674_v14  ;;  %v933_v19 = vsel %vm3405_vm11, %v928_v50, %v932_v48  ;;  %v429_v22 = vshrl.u32 %v281_v9, 16  ;;  %v945_v25 = vshrl.u32 %v3639_v12, 16  ;;  %v948_v26 = vshll.u32 %v3639_v12, 16 }
  0x5f   : > { %v943_v20 = vsel %vm3405_vm11, %v938_v53, %v942_v56  ;;  %v426_v13 = vor.u32 %v424_v18, %v423_v10  ;;  %v1274_v47 = vrot.slane %v1272_v11, 4  ;;  %v427_v36 = vrot.slane %v423_v10, 4  ;;  %v284_v61 = vld [vmem:[%s3373_s19 + $0x48] sm:$0xf]  ;;  %v3689_v50 = vld [vmem:[#allocation2 + $0x50] sm:$0x1] }
  0x60   : > { %v431_v37 = vrot.slane %v429_v22, 7  ;;  %v3667_v41 = vcombine.low %v933_v19, %v943_v20  ;;  %v958_v7 = vshrl.u32 %v3658_v21, 16  ;;  %v954_v34 = vshll.u32 %v3658_v21, 16  ;;  %v285_v10 = vld [vmem:[%s3373_s19 + $0x4c] sm:$0xf] }
  0x61   : > { %1667 = vrot.lane.b32.xlu1 %v3621_v28, %s3265_s26  ;;  %1665 = vrot.lane.b32.xlu0 %v3546_v23, %s3265_s26  ;;  %v282_v23 = vld [vmem:[%s3373_s19 + $0x40] sm:$0xf]  ;;  %v446_v44 = vshrl.u32 %v283_v24, 16  ;;  %v677_v46 = vsel %vm3399_vm10, %v426_v13, %v676_v30  ;;  %v947_v52 = vrot.slane %v945_v25, 4  ;;  %v950_v57 = vrot.slane %v948_v26, 5 }
  0x62   : > { %v438_v31 = vshrl.u32 %v282_v23, 16  ;;  %v441_v40 = vshll.u32 %v282_v23, 16  ;;  %v436_v48 = vrot.slane %v431_v37, 4  ;;  %678 = vst [vmem:[#allocation2 + $0x60] sm:$0xf] %v677_v46  ;;  %v449_v60 = vshll.u32 %v283_v24, 16 }
  0x63   : > { %v1273_v62 = vsel %vm3375_vm7, %v2802_v38, %v1272_v11  ;;  %v1276_v0 = vsel %vm3375_vm7, %v1274_v47, %v1275_v17  ;;  %v3686_v2 = vrot.slane %v954_v34, 5  ;;  %v960_v6 = vrot.slane %v958_v7, 4  ;;  %v3697_v14 = vld [vmem:[%s4723_s1 + $0x10] ss:$0 sps:$4 sm:$0x33]  }
  0x64   : > { %v440_v49 = vrot.slane %v438_v31, 7  ;;  %v681_v51 = vsel %vm3428_vm13, %v436_v48, %v680_v42  ;;  %v448_v56 = vrot.slane %v446_v44, 7  ;;  %v455_v11 = vshrl.u32 %v284_v61, 16  ;;  %v3707_v22 = vld [vmem:[#allocation2 + $0x54] sm:$0xf]  ;;  %3178 = vmatprep.subr.msk.bf16.mxu0 %vm2166_vm14, %v3697_v14 }
  0x65   : > { %1702 = vrot.lane.b32.xlu1 %v3634_v5, %s3263_s24  ;;  %1700 = vrot.lane.b32.xlu0 %v3524_v27, %s3263_s24  ;;  %v432_v27 = vshll.u32 %v281_v9, 16  ;;  %682 = vst [vmem:[#allocation2 + $0x68] sm:$0x1] %v681_v51  ;;  %v687_v9 = vld [vmem:[#allocation2 + $0x74] sm:$0x1]  ;;  %v3699_v23 = vcombine.low %v1273_v62, %v1276_v0  ;;  %v951_v38 = vor.u32 %v950_v57, %v947_v52  ;;  %v964_v20 = vshll.u32 %v3689_v50, 16 }
  0x66   : > { %v443_v59 = vor.u32 %v441_v40, %v440_v49  ;;  %v444_v53 = vrot.slane %v440_v49, 4  ;;  %v451_v17 = vor.u32 %v449_v60, %v448_v56  ;;  %v453_v18 = vrot.slane %v448_v56, 4  ;;  %v3709_v25 = vld [vmem:[#allocation2 + $0x58] sm:$0xf]  ;;  %v3742_v62 = vld [vmem:[#allocation2 + $0x5c] sm:$0x1] }
  0x67   : > { %v434_v45 = vor.u32 %v432_v27, %v431_v37  ;;  %v961_v19 = vor.u32 %v960_v6, %v3686_v2  ;;  %v457_v27 = vrot.slane %v455_v11, 7  ;;  %v458_v24 = vshll.u32 %v284_v61, 16  ;;  %v690_v48 = vld [vmem:[#allocation2 + $0x78] sm:$0xf]  ;;  %v286_v11 = vld [vmem:[%s3373_s19 + $0x50] sm:$0xf] }
  0x68   : > { %v684_v8 = vsel %vm3399_vm10, %v443_v59, %v683_v58  ;;  %v452_v26 = vsel %vm3413_vm12, %v444_v53, %v451_v17  ;;  %v688_v13 = vsel %vm3428_vm13, %v453_v18, %v687_v9  ;;  %v952_v30 = vrot.slane %v951_v38, 4  ;;  %v694_v9 = vld [vmem:[#allocation2 + $0x80] sm:$0x1] }
  0x69   : > { %1737 = vrot.lane.b32.xlu1 %v3650_v16, %s3262_s23  ;;  %1735 = vrot.lane.b32.xlu0 %v3593_v29, %s3262_s23  ;;  %v435_v55 = vsel %vm3413_vm12, %v427_v36, %v434_v45  ;;  %685 = vst [vmem:[#allocation2 + $0x6c] sm:$0xf] %v684_v8  ;;  %686 = vst.msk [vmem:[#allocation2 + $0x70] sm:$0xf] %vm210_vm0, %v452_v26  ;;  %v969_v31 = vshrl.u32 %v3707_v22, 16  ;;  %v972_v47 = vshll.u32 %v3707_v22, 16 }
  0x6a   : > { %679 = vst.msk [vmem:[#allocation2 + $0x64] sm:$0xf] %vm210_vm0, %v435_v55  ;;  %689 = vst [vmem:[#allocation2 + $0x74] sm:$0x1] %v688_v13  ;;  %v962_v36 = vrot.slane %v961_v19, 4  ;;  %v966_v37 = vrot.slane %v964_v20, 5  ;;  %v460_v42 = vor.u32 %v458_v24, %v457_v27  ;;  %v3729_v46 = vcombine.low %v3639_v12, %v3658_v21 }
  0x6b   : > { %v982_v40 = vshrl.u32 %v3709_v25, 16  ;;  %v978_v7 = vshll.u32 %v3709_v25, 16  ;;  %v1279_v34 = vrot.slane %v3658_v21, 5  ;;  %v466_v45 = vshll.u32 %v285_v10, 16  ;;  %v287_v24 = vld [vmem:[%s3373_s19 + $0x54] sm:$0xf] }
  0x6c   : > { %v957_v49 = vsel %vm3405_vm11, %v952_v30, %v3686_v2  ;;  %v2803_v52 = vrot.slane %v3639_v12, 9  ;;  %v971_v57 = vrot.slane %v969_v31, 4  ;;  %v974_v58 = vrot.slane %v972_v47, 5 }
  0x6d   : > { %1772 = vrot.lane.b32.xlu1 %v3667_v41, %s3266_s27  ;;  %1770 = vrot.lane.b32.xlu0 %v3621_v28, %s3266_s27  ;;  %v967_v55 = vsel %vm3405_vm11, %v962_v36, %v966_v37  ;;  %v980_v21 = vrot.slane %v978_v7, 5  ;;  %v984_v51 = vrot.slane %v982_v40, 4  ;;  %v461_v59 = vrot.slane %v457_v27, 4  ;;  %v3791_v40 = vld [vmem:[#allocation2 + $0x60] sm:$0xf] }
  0x6e   : > { %v1281_v60 = vrot.slane %v1279_v34, 4  ;;  %v1282_v61 = vrot.slane %v3689_v50, 5  ;;  %v691_v0 = vsel %vm3399_vm10, %v460_v42, %v690_v48  ;;  %v3746_v2 = vcombine.low %v957_v49, %v967_v55 }
  0x6f   : > { %692 = vst [vmem:[#allocation2 + $0x78] sm:$0xf] %v691_v0  ;;  %v985_v6 = vor.u32 %v984_v51, %v980_v21  ;;  %v988_v50 = vshll.u32 %v3742_v62, 16  ;;  %v1280_v56 = vsel %vm3375_vm7, %v2803_v52, %v1279_v34  ;;  %v2168_v38 = vsel %vm2166_vm14, %v3697_v14, 0  ;;  %v288_v52 = vld [vmem:[%s3373_s19 + $0x58] sm:$0xf] }
  0x70   : > { %v1283_v8 = vsel %vm3375_vm7, %v1281_v60, %v1282_v61  ;;  %v1286_v26 = vrot.slane %v3709_v25, 5  ;;  %3141 = vmatpush3.bf16.msra.mxu0 %v2168_v38  ;;  %v472_v14 = vshrl.u32 %v286_v11, 16  ;;  %v480_v31 = vshrl.u32 %v287_v24, 16  ;;  %v289_v60 = vld [vmem:[%s3373_s19 + $0x5c] sm:$0xf] }
  0x71   : > { %1519 = vrot.lane.b32.xlu1 %v3621_v28, %s3260_s21  ;;  %1805 = vrot.lane.b32.xlu0 %v3634_v5, %s3264_s25  ;;  %v463_v28 = vshrl.u32 %v285_v10, 16  ;;  %v3225_v10 = vld [vmem:[%s4723_s1 + $0x8] sm:$0xff]   ;;  %v3770_v18 = vcombine.low %v1280_v56, %v1283_v8  ;;  %v986_v20 = vrot.slane %v985_v6, 4  ;;  %v990_v27 = vrot.slane %v988_v50, 5 }
  0x72   : > { %3142 = vmatprep.subr.bf16.mxu0 %v3225_v10  ;;  %v474_v30 = vrot.slane %v472_v14, 7  ;;  %v3785_v47 = vcombine.low %v3707_v22, %v3709_v25  ;;  %v483_v7 = vshll.u32 %v287_v24, 16  ;;  %v2804_v34 = vrot.slane %v3707_v22, 9  ;;  %v3826_v24 = vld [vmem:[#allocation2 + $0x68] sm:$0x1] }
  0x73   : > { %v465_v44 = vrot.slane %v463_v28, 7  ;;  %v3226_v28 = vld [vmem:[%s4723_s1] sm:$0xff]   ;;  %v991_v37 = vsel %vm3405_vm11, %v986_v20, %v990_v27  ;;  %v1288_v42 = vrot.slane %v1286_v26, 4  ;;  %v1289_v25 = vrot.slane %v3742_v62, 5  ;;  %v704_v20 = vld [vmem:[#allocation2 + $0x90] sm:$0xf] }
  0x74   : > { %3143 = vmatpush3.bf16.msra.mxu0 %v3225_v10  ;;  %v478_v48 = vrot.slane %v474_v30, 4  ;;  %v482_v49 = vrot.slane %v480_v31, 7  ;;  %v996_v22 = vshll.u32 %v3791_v40, 16  ;;  %v492_v0 = vshll.u32 %v288_v52, 16 }
  0x75   : > { %1521 = vrot.lane.b32.xlu1 %v3667_v41, %s3260_s21  ;;  %1807 = vrot.lane.b32.xlu0 %v3699_v23, %s3264_s25  ;;  %v468_v12 = vor.u32 %v466_v45, %v465_v44  ;;  %v470_v17 = vrot.slane %v465_v44, 4  ;;  %v3794_v44 = vld [vmem:[#allocation2 + $0x64] sm:$0xf]  ;;  %v1287_v6 = vsel %vm3375_vm7, %v2804_v34, %v1286_v26  ;;  %v1290_v50 = vsel %vm3375_vm7, %v1288_v42, %v1289_v25  ;;  %v708_v42 = vld [vmem:[#allocation2 + $0x98] sm:$0x1] }
  0x76   : > { %3144 = vmatprep.subr.bf16.mxu0 %v3226_v28  ;;  %v1006_v55 = vshrl.u32 %v3794_v44, 16  ;;  %v1002_v61 = vshll.u32 %v3794_v44, 16  ;;  %v487_v62 = vrot.slane %v482_v49, 4  ;;  %v497_v10 = vshrl.u32 %v289_v60, 16 }
  0x77   : > { %v469_v53 = vsel %vm3413_vm12, %v461_v59, %v468_v12  ;;  %v695_v13 = vsel %vm3428_vm13, %v470_v17, %v694_v9  ;;  %v701_v59 = vld [vmem:[#allocation2 + $0x8c] sm:$0x1]  ;;  %v489_v12 = vshrl.u32 %v288_v52, 16  ;;  %v998_v38 = vrot.slane %v996_v22, 5 }
  0x78   : > { %693 = vst.msk [vmem:[#allocation2 + $0x7c] sm:$0xf] %vm210_vm0, %v469_v53  ;;  %696 = vst [vmem:[#allocation2 + $0x80] sm:$0x1] %v695_v13  ;;  %3145 = vmatpush3.bf16.msra.mxu0 %v3226_v28  ;;  %v702_v8 = vsel %vm3428_vm13, %v487_v62, %v701_v59  ;;  %v1008_v17 = vrot.slane %v1006_v55, 4  ;;  %v3828_v26 = vrot.slane %v1002_v61, 5 }
  0x79   : > { %1601 = vrot.lane.b32.xlu1 %v3699_v23, %s3259_s20  ;;  %1599 = vrot.lane.b32.xlu0 %v3634_v5, %s3259_s20  ;;  %v975_v5 = vor.u32 %v974_v58, %v971_v57  ;;  %v993_v58 = vshrl.u32 %v3791_v40, 16  ;;  %v491_v9 = vrot.slane %v489_v12, 7  ;;  %703 = vst [vmem:[#allocation2 + $0x8c] sm:$0x1] %v702_v8  ;;  %v499_v28 = vrot.slane %v497_v10, 7 }
  0x7a   : > { %v1012_v25 = vshll.u32 %v3826_v24, 16  ;;  %v1009_v22 = vor.u32 %v1008_v17, %v3828_v26  ;;  %v3842_v55 = vld [vmem:[#allocation2 + $0x70] sm:$0xf]  ;;  %v715_v62 = vld [vmem:[#allocation2 + $0xa4] sm:$0x1]  ;;  %v1293_v12 = vrot.slane %v3794_v44, 5 }
  0x7b   : > { %v976_v19 = vrot.slane %v975_v5, 4  ;;  %v290_v5 = vld [vmem:[%s3373_s19 + $0x60] sm:$0xf]  ;;  %v995_v56 = vrot.slane %v993_v58, 4  ;;  %v494_v13 = vor.u32 %v492_v0, %v491_v9  ;;  %v495_v14 = vrot.slane %v491_v9, 4 }
  0x7c   : > { %v506_v27 = vshrl.u32 %v290_v5, 16  ;;  %v504_v34 = vrot.slane %v499_v28, 4  ;;  %v1010_v8 = vrot.slane %v1009_v22, 4  ;;  %v1296_v17 = vrot.slane %v3826_v24, 5 }
  0x7d   : > { %1636 = vrot.lane.b32.xlu1 %v3729_v46, %s3261_s22  ;;  %1634 = vrot.lane.b32.xlu0 %v3650_v16, %s3261_s22  ;;  %v981_v36 = vsel %vm3405_vm11, %v976_v19, %v980_v21  ;;  %v485_v21 = vor.u32 %v483_v7, %v482_v49  ;;  %v500_v19 = vshll.u32 %v289_v60, 16  ;;  %v705_v7 = vsel %vm3399_vm10, %v494_v13, %v704_v20 }
  0x7e   : > { %v3798_v57 = vcombine.low %v981_v36, %v991_v37  ;;  %v3830_v36 = vcombine.low %v1287_v6, %v1290_v50  ;;  %706 = vst [vmem:[#allocation2 + $0x90] sm:$0xf] %v705_v7  ;;  %v999_v58 = vor.u32 %v998_v38, %v995_v56  ;;  %v1014_v6 = vrot.slane %v1012_v25, 5  ;;  %v293_v25 = vld [vmem:[%s3373_s19 + $0x6c] sm:$0xf] }
  0x7f   : > { %v486_v53 = vsel %vm3413_vm12, %v478_v48, %v485_v21  ;;  %v502_v37 = vor.u32 %v500_v19, %v499_v28  ;;  %v1030_v50 = vshrl.u32 %v3842_v55, 16  ;;  %v1295_v38 = vrot.slane %v1293_v12, 4 }
  0x80   : > { %700 = vst.msk [vmem:[#allocation2 + $0x88] sm:$0xf] %vm210_vm0, %v486_v53  ;;  %v1026_v53 = vshll.u32 %v3842_v55, 16  ;;  %v1000_v56 = vrot.slane %v999_v58, 4  ;;  %v1015_v24 = vsel %vm3405_vm11, %v1010_v8, %v1014_v6  ;;  %v295_v8 = vld [vmem:[%s3373_s19 + $0x74] sm:$0xf] }
  0x81   : > { %1671 = vrot.lane.b32.xlu1 %v3746_v2, %s3265_s26  ;;  %1669 = vrot.lane.b32.xlu0 %v3667_v41, %s3265_s26  ;;  %v475_v41 = vshll.u32 %v286_v11, 16  ;;  %v291_v11 = vld [vmem:[%s3373_s19 + $0x64] sm:$0xf]  ;;  %v503_v21 = vsel %vm3413_vm12, %v495_v14, %v502_v37  ;;  %v1032_v14 = vrot.slane %v1030_v50, 4  ;;  %vm1981_vm3 = vcmask 162816  }
  0x82   : > { %v514_v31 = vshrl.u32 %v291_v11, 16  ;;  %v517_v52 = vshll.u32 %v291_v11, 16  ;;  %707 = vst.msk [vmem:[#allocation2 + $0x94] sm:$0xf] %vm210_vm0, %v503_v21  ;;  %v2805_v11 = vrot.slane %v3791_v40, 9  ;;  %v1028_v13 = vrot.slane %v1026_v53, 5 }
  0x83   : > { %v477_v45 = vor.u32 %v475_v41, %v474_v30  ;;  %v508_v41 = vrot.slane %v506_v27, 7  ;;  %v509_v30 = vshll.u32 %v290_v5, 16  ;;  %v3873_v27 = vcombine.low %v3791_v40, %v3794_v44 }
  0x84   : > { %v516_v49 = vrot.slane %v514_v31, 7  ;;  %v1005_v28 = vsel %vm3405_vm11, %v1000_v56, %v3828_v26  ;;  %v1294_v31 = vsel %vm3375_vm7, %v2805_v11, %v1293_v12  ;;  %v1033_v26 = vor.u32 %v1032_v14, %v1028_v13 }
  0x85   : > { %1706 = vrot.lane.b32.xlu1 %v3770_v18, %s3263_s24  ;;  %1704 = vrot.lane.b32.xlu0 %v3699_v23, %s3263_s24  ;;  %v697_v23 = vld [vmem:[#allocation2 + $0x84] sm:$0xf]  ;;  %v511_v48 = vor.u32 %v509_v30, %v508_v41  ;;  %v292_v30 = vld [vmem:[%s3373_s19 + $0x68] sm:$0xf]  ;;  %v3889_v44 = vcombine.low %v1005_v28, %v1015_v24  ;;  %v534_v11 = vshll.u32 %v293_v25, 16  ;;  %vm2014_vm4 = vcmask 195584  }
  0x86   : > { %v698_v51 = vsel %vm3399_vm10, %v477_v45, %v697_v23  ;;  %v711_v23 = vld [vmem:[#allocation2 + $0x9c] sm:$0xf]  ;;  %v3839_v45 = vld [vmem:[#allocation2 + $0x6c] sm:$0xf]  ;;  %v519_v59 = vor.u32 %v517_v52, %v516_v49  ;;  %v521_v61 = vrot.slane %v516_v49, 4  ;;  %v523_v7 = vshrl.u32 %v292_v30, 16 }
  0x87   : > { %699 = vst [vmem:[#allocation2 + $0x84] sm:$0xf] %v698_v51  ;;  %v709_v51 = vsel %vm3428_vm13, %v504_v34, %v708_v42  ;;  %v712_v60 = vsel %vm3399_vm10, %v511_v48, %v711_v23  ;;  %v1017_v0 = vshrl.u32 %v3839_v45, 16  ;;  %v1020_v5 = vshll.u32 %v3839_v45, 16 }
  0x88   : > { %710 = vst [vmem:[#allocation2 + $0x98] sm:$0x1] %v709_v51  ;;  %713 = vst [vmem:[#allocation2 + $0x9c] sm:$0xf] %v712_v60  ;;  %v716_v10 = vsel %vm3428_vm13, %v521_v61, %v715_v62  ;;  %v1300_v34 = vrot.slane %v3842_v55, 5  ;;  %v1034_v48 = vrot.slane %v1033_v26, 4 }
  0x89   : > { %1741 = vrot.lane.b32.xlu1 %v3785_v47, %s3262_s23  ;;  %1739 = vrot.lane.b32.xlu0 %v3729_v46, %s3262_s23  ;;  %717 = vst [vmem:[#allocation2 + $0xa4] sm:$0x1] %v716_v10  ;;  %v1019_v19 = vrot.slane %v1017_v0, 4  ;;  %v1022_v20 = vrot.slane %v1020_v5, 5  ;;  %v525_v52 = vrot.slane %v523_v7, 7  ;;  %v526_v58 = vshll.u32 %v292_v30, 16 }
  0x8a   : > { %v2806_v22 = vrot.slane %v3839_v45, 9  ;;  %v1302_v21 = vrot.slane %v1300_v34, 4  ;;  %v3900_v51 = vld [vmem:[#allocation2 + $0x78] sm:$0xf]  ;;  %v3904_v60 = vld [vmem:[#allocation2 + $0x7c] sm:$0xf] }
  0x8b   : > { %v1023_v40 = vor.u32 %v1022_v20, %v1019_v19  ;;  %v531_v61 = vshrl.u32 %v293_v25, 16  ;;  %v718_v62 = vld [vmem:[#allocation2 + $0xa8] sm:$0xf]  ;;  %v1041_v6 = vshrl.u32 %v3900_v51, 16  ;;  %v1050_v56 = vshll.u32 %v3904_v60, 16 }
  0x8c   : > { %v1301_v50 = vsel %vm3375_vm7, %v2806_v22, %v1300_v34  ;;  %v1054_v20 = vshrl.u32 %v3904_v60, 16  ;;  %v297_v7 = vld [vmem:[%s3373_s19 + $0x7c] sm:$0xf]  ;;  %vm2047_vm5 = vcmask 228352   ;;  %vm2080_vm6 = vcmask 261120  }
  0x8d   : > { %1776 = vrot.lane.b32.xlu1 %v3798_v57, %s3266_s27  ;;  %1774 = vrot.lane.b32.xlu0 %v3746_v2, %s3266_s27  ;;  %v1024_v23 = vrot.slane %v1023_v40, 4  ;;  %v533_v10 = vrot.slane %v531_v61, 7  ;;  %v3946_v25 = vrot.slane %v1050_v56, 5  ;;  %v729_v61 = vld [vmem:[#allocation2 + $0xbc] sm:$0x1]  ;;  %vm2133_vm8 = vcmask 293888  }
  0x8e   : > { %v1056_v22 = vrot.slane %v1054_v20, 4 }
  0x8f   : > { %v1029_v0 = vsel %vm3405_vm11, %v1024_v23, %v1028_v13  ;;  %v722_v13 = vld [vmem:[#allocation2 + $0xb0] sm:$0x1]  ;;  %v536_v30 = vor.u32 %v534_v11, %v533_v10 }
  0x91   : > { %1523 = vrot.lane.b32.xlu1 %v3746_v2, %s3260_s21  ;;  %1809 = vrot.lane.b32.xlu0 %v3770_v18, %s3264_s25  ;;  %v512_v2 = vrot.slane %v508_v41, 4  ;;  %v772_v41 = vld [vmem:[#allocation2 + $0x74] sm:$0x1] }
  0x92   : > { %v1036_v37 = vshll.u32 %v772_v41, 16 }
  0x93   : > { %v520_v9 = vsel %vm3413_vm12, %v512_v2, %v519_v59  ;;  %v1303_v2 = vrot.slane %v772_v41, 5  ;;  %v3941_v41 = vrot.slane %v1041_v6, 4 }
  0x94   : > { %714 = vst.msk [vmem:[#allocation2 + $0xa0] sm:$0xf] %vm210_vm0, %v520_v9  ;;  %v1038_v49 = vrot.slane %v1036_v37, 5  ;;  %v529_v9 = vrot.slane %v525_v52, 4  ;;  %v551_v37 = vshll.u32 %v295_v8, 16 }
  0x95   : > { %1525 = vrot.lane.b32.xlu1 %v3798_v57, %s3260_s21  ;;  %1811 = vrot.lane.b32.xlu0 %v3830_v36, %s3264_s25  ;;  %v1304_v53 = vsel %vm3375_vm7, %v1302_v21, %v1303_v2 }
  0x96   : > { %v1039_v5 = vsel %vm3405_vm11, %v1034_v48, %v1038_v49  ;;  %v537_v48 = vsel %vm3413_vm12, %v529_v9, %v536_v30  ;;  %v732_v9 = vld [vmem:[#allocation2 + $0xc0] sm:$0xf]  ;;  %v1057_v30 = vor.u32 %v1056_v22, %v3946_v25 }
  0x97   : > { %v3932_v19 = vcombine.low %v1029_v0, %v1039_v5  ;;  %721 = vst.msk [vmem:[#allocation2 + $0xac] sm:$0xf] %vm210_vm0, %v537_v48 }
  0x98   : > { %v1058_v48 = vrot.slane %v1057_v30, 4 }
  0x99   : > { %1605 = vrot.lane.b32.xlu1 %v3830_v36, %s3259_s20  ;;  %1603 = vrot.lane.b32.xlu0 %v3770_v18, %s3259_s20  ;;  %v1297_v18 = vsel %vm3375_vm7, %v1295_v38, %v1296_v17  ;;  %v296_v17 = vld [vmem:[%s3373_s19 + $0x78] sm:$0xf] }
  0x9a   : > { %v3892_v42 = vcombine.low %v1294_v31, %v1297_v18  ;;  %v538_v31 = vrot.slane %v533_v10, 4  ;;  %v548_v18 = vshrl.u32 %v295_v8, 16  ;;  %v557_v34 = vshrl.u32 %v296_v17, 16 }
  0x9b   : > { %v560_v6 = vshll.u32 %v296_v17, 16  ;;  %v568_v8 = vshll.u32 %v297_v7, 16 }
  0x9c   : > { %v723_v49 = vsel %vm3428_vm13, %v538_v31, %v722_v13  ;;  %v736_v31 = vld [vmem:[#allocation2 + $0xc8] sm:$0x1] }
  0x9d   : > { %1640 = vrot.lane.b32.xlu1 %v3873_v27, %s3261_s22  ;;  %1638 = vrot.lane.b32.xlu0 %v3785_v47, %s3261_s22  ;;  %724 = vst [vmem:[#allocation2 + $0xb0] sm:$0x1] %v723_v49 }
  0x9e   : > { %v3902_v59 = vpop.permute.xlu1 %1591 }
  0xa0   : > { %v3914_v12 = vpop.permute.xlu0 %1511 }
  0xa1   : > { %1675 = vrot.lane.b32.xlu1 %v3889_v44, %s3265_s26  ;;  %1673 = vrot.lane.b32.xlu0 %v3798_v57, %s3265_s26  ;;  %v3908_v57 = vcombine.low %v3839_v45, %v3842_v55  ;;  %v528_v45 = vor.u32 %v526_v58, %v525_v52  ;;  %v294_v55 = vld [vmem:[%s3373_s19 + $0x70] sm:$0xf]  ;;  %v550_v52 = vrot.slane %v548_v18, 7  ;;  %v725_v58 = vld [vmem:[#allocation2 + $0xb4] sm:$0xf] }
  0xa2   : > { %v540_v14 = vshrl.u32 %v294_v55, 16  ;;  %v543_v28 = vshll.u32 %v294_v55, 16  ;;  %v3957_v55 = vld [vmem:[#allocation2 + $0x80] sm:$0x1] }
  0xa3   : > { %v719_v38 = vsel %vm3399_vm10, %v528_v45, %v718_v62  ;;  %v559_v62 = vrot.slane %v557_v34, 7  ;;  %v553_v0 = vor.u32 %v551_v37, %v550_v52  ;;  %v555_v5 = vrot.slane %v550_v52, 4  ;;  %v3983_v37 = vld [vmem:[#allocation2 + $0x84] sm:$0xf] }
  0xa4   : > { %720 = vst [vmem:[#allocation2 + $0xa8] sm:$0xf] %v719_v38  ;;  %v542_v26 = vrot.slane %v540_v14, 7  ;;  %v565_v45 = vshrl.u32 %v297_v7, 16  ;;  %v3969_v14 = vcombine.low %v1301_v50, %v1304_v53  ;;  %v1060_v18 = vshll.u32 %v3957_v55, 16 }
  0xa5   : > { %1710 = vrot.lane.b32.xlu1 %v3892_v42, %s3263_s24  ;;  %1708 = vrot.lane.b32.xlu0 %v3830_v36, %s3263_s24  ;;  %v1044_v36 = vshll.u32 %v3900_v51, 16  ;;  %v563_v56 = vrot.slane %v559_v62, 4  ;;  %v730_v17 = vsel %vm3428_vm13, %v555_v5, %v729_v61  ;;  %v562_v20 = vor.u32 %v560_v6, %v559_v62  ;;  %v3985_v7 = vld [vmem:[#allocation2 + $0x88] sm:$0xf] }
  0xa6   : > { %v545_v21 = vor.u32 %v543_v28, %v542_v26  ;;  %v546_v2 = vrot.slane %v542_v26, 4  ;;  %v567_v13 = vrot.slane %v565_v45, 7  ;;  %731 = vst [vmem:[#allocation2 + $0xbc] sm:$0x1] %v730_v17  ;;  %v1062_v49 = vrot.slane %v1060_v18, 5 }
  0xa7   : > { %v1046_v40 = vrot.slane %v1044_v36, 5  ;;  %v733_v50 = vsel %vm3399_vm10, %v562_v20, %v732_v9  ;;  %v1307_v52 = vrot.slane %v3904_v60, 5  ;;  %v1065_v43 = vshrl.u32 %v3983_v37, 16 }
  0xa8   : > { %v726_v36 = vsel %vm3399_vm10, %v545_v21, %v725_v58  ;;  %v554_v38 = vsel %vm3413_vm12, %v546_v2, %v553_v0  ;;  %v570_v26 = vor.u32 %v568_v8, %v567_v13  ;;  %v572_v53 = vrot.slane %v567_v13, 4  ;;  %734 = vst [vmem:[#allocation2 + $0xc0] sm:$0xf] %v733_v50 }
  0xa9   : > { %1745 = vrot.lane.b32.xlu1 %v3908_v57, %s3262_s23  ;;  %1743 = vrot.lane.b32.xlu0 %v3873_v27, %s3262_s23  ;;  %v3939_v24 = vpop.permute.xlu1 %1628  ;;  %727 = vst [vmem:[#allocation2 + $0xb4] sm:$0xf] %v726_v36  ;;  %v1047_v28 = vor.u32 %v1046_v40, %v3941_v41  ;;  %728 = vst.msk [vmem:[#allocation2 + $0xb8] sm:$0xf] %vm210_vm0, %v554_v38  ;;  %v1068_v58 = vshll.u32 %v3983_v37, 16  ;;  %v1078_v63 = vshrl.u32 %v3985_v7, 16 }
  0xaa   : > { %v737_v34 = vsel %vm3428_vm13, %v572_v53, %v736_v31  ;;  %v1074_v22 = vshll.u32 %v3985_v7, 16  ;;  %v4005_v61 = vcombine.low %v3900_v51, %v3904_v60  ;;  %v2807_v62 = vrot.slane %v3900_v51, 9  ;;  %v4018_v60 = vld [vmem:[#allocation2 + $0x8c] sm:$0x1] }
  0xab   : > { %v3944_v23 = vpop.permute.xlu0 %1626  ;;  %738 = vst [vmem:[#allocation2 + $0xc8] sm:$0x1] %v737_v34  ;;  %v1048_v33 = vrot.slane %v1047_v28, 4  ;;  %v1063_v5 = vsel %vm3405_vm11, %v1058_v48, %v1062_v49  ;;  %v1309_v6 = vrot.slane %v1307_v52, 4  ;;  %v1310_v45 = vrot.slane %v3957_v55, 5 }
  0xac   : > { %v1067_v36 = vrot.slane %v1065_v43, 4  ;;  %v1070_v51 = vrot.slane %v1068_v58, 5  ;;  %v1080_v8 = vrot.slane %v1078_v63, 4  ;;  %v1308_v55 = vsel %vm3375_vm7, %v2807_v62, %v1307_v52  ;;  %v4077_v43 = vld [vmem:[#allocation2 + $0x90] sm:$0xf] }
  0xad   : > { %1780 = vrot.lane.b32.xlu1 %v3932_v19, %s3266_s27  ;;  %1778 = vrot.lane.b32.xlu0 %v3889_v44, %s3266_s27  ;;  %v1053_v0 = vsel %vm3405_vm11, %v1048_v33, %v3946_v25  ;;  %v1084_v25 = vshll.u32 %v4018_v60, 16  ;;  %v1311_v17 = vsel %vm3375_vm7, %v1309_v6, %v1310_v45  ;;  %v1836_v28 = vsel %vm1833_vm15, %v2815_v32, %v3914_v12  ;;  %v4082_v63 = vld [vmem:[#allocation2 + $0x94] sm:$0xf] }
  0xae   : > { %v1071_v20 = vor.u32 %v1070_v51, %v1067_v36  ;;  %v4045_v3 = vcombine.low %v1308_v55, %v1311_v17  ;;  %v1314_v48 = vrot.slane %v3985_v7, 5  ;;  %v1092_v6 = vshll.u32 %v4077_v43, 16 }
  0xaf   : > { %v3961_v10 = vpop.permute.xlu1 %1733  ;;  %v3963_v11 = vpop.permute.xlu0 %1731  ;;  %v1086_v4 = vrot.slane %v1084_v25, 5  ;;  %v1102_v45 = vshrl.u32 %v4082_v63, 16 }
  0xb1   : > { %1527 = vrot.lane.b32.xlu1 %v3889_v44, %s3260_s21  ;;  %1813 = vrot.lane.b32.xlu0 %v3892_v42, %s3264_s25  ;;  %v571_v44 = vsel %vm3413_vm12, %v563_v56, %v570_v26  ;;  %v1076_v56 = vrot.slane %v1074_v22, 5  ;;  %v1317_v22 = vrot.slane %v4018_v60, 5  ;;  %v1098_v60 = vshll.u32 %v4082_v63, 16 }
  0xb2   : > { %735 = vst.msk [vmem:[#allocation2 + $0xc4] sm:$0xf] %vm210_vm0, %v571_v44  ;;  %vm1882_vm0 = vcmask 64512   ;;  %v1104_v55 = vrot.slane %v1102_v45, 4 }
  0xb3   : > { %v3981_v41 = vpop.permute.xlu0 %1696  ;;  %v1594_v40 = vpop.permute.xlu1 %1593  ;;  %v1081_v13 = vor.u32 %v1080_v8, %v1076_v56  ;;  %v1884_v32 = vsel %vm1882_vm0, %v1836_v28, %v3902_v59  ;;  %v781_v8 = vld [vmem:[#allocation2 + $0x98] sm:$0x1]  ;;  %v1100_v25 = vrot.slane %v1098_v60, 5 }
  0xb4   : > { %v1917_v53 = vsel %vm1915_vm1, %v1884_v32, %v3944_v23  ;;  %v1108_v28 = vshll.u32 %v781_v8, 16  ;;  %v4123_v32 = vld [vmem:[#allocation2 + $0xa0] sm:$0xf] }
  0xb5   : > { %1529 = vrot.lane.b32.xlu1 %v3932_v19, %s3260_s21  ;;  %1815 = vrot.lane.b32.xlu0 %v3969_v14, %s3264_s25  ;;  %v1082_v50 = vrot.slane %v1081_v13, 4 }
  0xb7   : > { %v4001_v21 = vpop.permute.xlu0 %1801  ;;  %v1699_v2 = vpop.permute.xlu1 %1698  ;;  %v1087_v52 = vsel %vm3405_vm11, %v1082_v50, %v1086_v4 }
  0xb9   : > { %1609 = vrot.lane.b32.xlu1 %v3969_v14, %s3259_s20  ;;  %1607 = vrot.lane.b32.xlu0 %v3892_v42, %s3259_s20  ;;  %v4026_v42 = vcombine.low %v1053_v0, %v1063_v5  ;;  %v1316_v0 = vrot.slane %v1314_v48, 4  ;;  %v1089_v5 = vshrl.u32 %v4077_v43, 16 }
  0xbb   : > { %v4020_v9 = vpop.permute.xlu0 %1803  ;;  %v1664_v38 = vpop.permute.xlu1 %1663 }
  0xbd   : > { %1644 = vrot.lane.b32.xlu1 %v4005_v61, %s3261_s22  ;;  %1642 = vrot.lane.b32.xlu0 %v3908_v57, %s3261_s22 }
  0xbf   : > { %v1769_v30 = vpop.permute.xlu1 %1768  ;;  %v1514_v31 = vpop.permute.xlu0 %1513 }
  0xc0   : > { %v1839_v18 = vsel %vm1833_vm15, %v3470_v54, %v1514_v31  ;;  %v1072_v54 = vrot.slane %v1071_v20, 4  ;;  %v1105_v31 = vor.u32 %v1104_v55, %v1100_v25 }
  0xc1   : > { %v1886_v26 = vsel %vm1882_vm0, %v1839_v18, %v1594_v40  ;;  %1679 = vrot.lane.b32.xlu1 %v4026_v42, %s3265_s26  ;;  %1677 = vrot.lane.b32.xlu0 %v3932_v19, %s3265_s26  ;;  %v4121_v18 = vld [vmem:[#allocation2 + $0x9c] sm:$0xf] }
  0xc2   : > { %v1919_v12 = vsel %vm1915_vm1, %v1886_v26, %v3939_v24  ;;  %v4066_v24 = vcombine.low %v3983_v37, %v3985_v7  ;;  %v1116_v50 = vshll.u32 %v4121_v18, 16 }
  0xc3   : > { %v1952_v40 = vsel %vm1948_vm2, %v1919_v12, %v1664_v38  ;;  %v4054_v44 = vpop.permute.xlu1 %1515  ;;  %v1662_v19 = vpop.permute.xlu0 %1661  ;;  %v1094_v38 = vrot.slane %v1092_v6, 5  ;;  %v1321_v12 = vrot.slane %v4082_v63, 5 }
  0xc4   : > { %v1950_v34 = vsel %vm1948_vm2, %v1917_v53, %v1662_v19  ;;  %v1985_v33 = vsel %vm1981_vm3, %v1952_v40, %v1699_v2  ;;  %v1106_v40 = vrot.slane %v1105_v31, 4  ;;  %v1126_v19 = vshrl.u32 %v4123_v32, 16 }
  0xc5   : > { %v1983_v59 = vsel %vm1981_vm3, %v1950_v34, %v3981_v41  ;;  %1714 = vrot.lane.b32.xlu1 %v4045_v3, %s3263_s24  ;;  %1712 = vrot.lane.b32.xlu0 %v3969_v14, %s3263_s24  ;;  %v2018_v23 = vsel %vm2014_vm4, %v1985_v33, %v3961_v10  ;;  %v1077_v41 = vsel %vm3405_vm11, %v1072_v54, %v1076_v56  ;;  %v1113_v54 = vshrl.u32 %v4121_v18, 16 }
  0xc6   : > { %v2016_v49 = vsel %vm2014_vm4, %v1983_v59, %v3963_v11  ;;  %v2051_v10 = vsel %vm2047_vm5, %v2018_v23, %v1769_v30  ;;  %v2808_v11 = vrot.slane %v3983_v37, 9  ;;  %v4093_v62 = vcombine.low %v1077_v41, %v1087_v52 }
  0xc7   : > { %v4079_v14 = vpop.permute.xlu1 %1517  ;;  %v1767_v58 = vpop.permute.xlu0 %1766  ;;  %v2084_v37 = vsel %vm2080_vm6, %v2051_v10, %v4020_v9  ;;  %v1318_v56 = vsel %vm3375_vm7, %v1316_v0, %v1317_v22  ;;  %v1091_v9 = vrot.slane %v1089_v5, 4  ;;  %v1122_v34 = vshll.u32 %v4123_v32, 16 }
  0xc8   : > { %v2049_v7 = vsel %vm2047_vm5, %v2016_v49, %v1767_v58  ;;  %v1315_v51 = vsel %vm3375_vm7, %v2808_v11, %v1314_v48  ;;  %v4136_v23 = vcombine.low %v4077_v43, %v4082_v63  ;;  %v2809_v48 = vrot.slane %v4077_v43, 9 }
  0xc9   : > { %1749 = vrot.lane.b32.xlu1 %v4066_v24, %s3262_s23  ;;  %1747 = vrot.lane.b32.xlu0 %v4005_v61, %s3262_s23  ;;  %v2082_v2 = vsel %vm2080_vm6, %v2049_v7, %v4001_v21  ;;  %v4119_v13 = vcombine.low %v1315_v51, %v1318_v56  ;;  %v1095_v30 = vor.u32 %v1094_v38, %v1091_v9  ;;  %v1323_v49 = vrot.slane %v1321_v12, 4 }
  0xca   : > { %3146 = vmatprep.mubr.msk.bf16.mxu0 %vm2133_vm8, %v2082_v2  ;;  %v1324_v41 = vrot.slane %v781_v8, 5  ;;  %v1115_v52 = vrot.slane %v1113_v54, 4  ;;  %v1118_v58 = vrot.slane %v1116_v50, 5  ;;  %v1124_v63 = vrot.slane %v1122_v34, 5  ;;  %v4147_v2 = vld [vmem:[#allocation2 + $0xa4] sm:$0x1] }
  0xcb   : > { %v4102_v36 = vpop.permute.xlu1 %1597  ;;  %3147 = vmatmul.mubr.msk.bf16.vlgmr.msra.gmra.mxu0 %vm2133_vm8, %v2084_v37  ;;  %v1596_v21 = vpop.permute.xlu0 %1595  ;;  %v1096_v53 = vrot.slane %v1095_v30, 4  ;;  %v1128_v11 = vrot.slane %v1126_v19, 4  ;;  %v1322_v0 = vsel %vm3375_vm7, %v2809_v48, %v1321_v12  ;;  %v1132_v51 = vshll.u32 %v4147_v2, 16  ;;  %v4207_v34 = vld [vmem:[#allocation2 + $0xac] sm:$0xf] }
  0xcc   : > { %v1119_v37 = vor.u32 %v1118_v58, %v1115_v52  ;;  %v1325_v45 = vsel %vm3375_vm7, %v1323_v49, %v1324_v41  ;;  %v1845_v9 = vsel %vm1833_vm15, %v3487_v15, %v4079_v14  ;;  %v1328_v50 = vrot.slane %v4123_v32, 5 }
  0xcd   : > { %1784 = vrot.lane.b32.xlu1 %v4093_v62, %s3266_s27  ;;  %1782 = vrot.lane.b32.xlu0 %v4026_v42, %s3266_s27  ;;  %v1101_v10 = vsel %vm3405_vm11, %v1096_v53, %v1100_v25  ;;  %v1129_v60 = vor.u32 %v1128_v11, %v1124_v63  ;;  %v1890_v55 = vsel %vm1882_vm0, %v1845_v9, %v4102_v36  ;;  %v1134_v30 = vrot.slane %v1132_v51, 5  ;;  %v4202_v53 = vld [vmem:[#allocation2 + $0xa8] sm:$0xf]  ;;  %v4243_v9 = vld [vmem:[#allocation2 + $0xb8] sm:$0xf] }
  0xce   : > { %v1120_v25 = vrot.slane %v1119_v37, 4  ;;  %v4193_v36 = vcombine.low %v4121_v18, %v4123_v32  ;;  %v2810_v32 = vrot.slane %v4121_v18, 9  ;;  %v1137_v48 = vshrl.u32 %v4202_v53, 16 }
  0xcf   : > { %v4113_v17 = vpop.permute.xlu1 %1632  ;;  %v1631_v20 = vpop.permute.xlu0 %1630  ;;  %v1140_v49 = vshll.u32 %v4202_v53, 16  ;;  %v1330_v41 = vrot.slane %v1328_v50, 4  ;;  %v1331_v52 = vrot.slane %v4147_v2, 5  ;;  %v1150_v58 = vshrl.u32 %v4207_v34, 16  ;;  %v787_v2 = vld [vmem:[#allocation2 + $0xb0] sm:$0x1] }
  0xd0   : > { %v1923_v15 = vsel %vm1915_vm1, %v1890_v55, %v4113_v17  ;;  %v1139_v18 = vrot.slane %v1137_v48, 4  ;;  %v1156_v51 = vshll.u32 %v787_v2, 16 }
  0xd1   : > { %1531 = vrot.lane.b32.xlu1 %v4026_v42, %s3260_s21  ;;  %1817 = vrot.lane.b32.xlu0 %v4045_v3, %s3264_s25  ;;  %v1110_v42 = vrot.slane %v1108_v28, 5  ;;  %v1130_v28 = vrot.slane %v1129_v60, 4  ;;  %v1142_v11 = vrot.slane %v1140_v49, 5 }
  0xd3   : > { %v1668_v26 = vpop.permute.xlu1 %1667  ;;  %v1666_v4 = vpop.permute.xlu0 %1665  ;;  %v1111_v7 = vsel %vm3405_vm11, %v1106_v40, %v1110_v42  ;;  %v1135_v54 = vsel %vm3405_vm11, %v1130_v28, %v1134_v30  ;;  %v1143_v60 = vor.u32 %v1142_v11, %v1139_v18  ;;  %v1174_v30 = vshrl.u32 %v4243_v9, 16 }
  0xd4   : > { %v4158_v5 = vcombine.low %v1101_v10, %v1111_v7  ;;  %v1146_v10 = vshll.u32 %v4207_v34, 16 }
  0xd5   : > { %1533 = vrot.lane.b32.xlu1 %v4093_v62, %s3260_s21  ;;  %1819 = vrot.lane.b32.xlu0 %v4119_v13, %s3264_s25 }
  0xd7   : > { %v1703_v33 = vpop.permute.xlu1 %1702  ;;  %v1701_v59 = vpop.permute.xlu0 %1700 }
  0xd9   : > { %1613 = vrot.lane.b32.xlu1 %v4119_v13, %s3259_s20  ;;  %1611 = vrot.lane.b32.xlu0 %v4045_v3, %s3259_s20  ;;  %v1842_v3 = vsel %vm1833_vm15, %v3457_v39, %v4054_v44 }
  0xda   : > { %v1888_v6 = vsel %vm1882_vm0, %v1842_v3, %v1596_v21  ;;  %v4174_v21 = vcombine.low %v1322_v0, %v1325_v45  ;;  %v1148_v0 = vrot.slane %v1146_v10, 5  ;;  %v1152_v3 = vrot.slane %v1150_v58, 4 }
  0xdb   : > { %v1738_v22 = vpop.permute.xlu1 %1737  ;;  %v1736_v43 = vpop.permute.xlu0 %1735  ;;  %v1921_v56 = vsel %vm1915_vm1, %v1888_v6, %v1631_v20 }
  0xdc   : > { %v1954_v8 = vsel %vm1948_vm2, %v1921_v56, %v1666_v4  ;;  %v1153_v56 = vor.u32 %v1152_v3, %v1148_v0 }
  0xdd   : > { %1648 = vrot.lane.b32.xlu1 %v4136_v23, %s3261_s22  ;;  %1646 = vrot.lane.b32.xlu0 %v4066_v24, %s3261_s22  ;;  %v1987_v38 = vsel %vm1981_vm3, %v1954_v8, %v1701_v59 }
  0xde   : > { %v2020_v20 = vsel %vm2014_vm4, %v1987_v38, %v1736_v43  ;;  %v1332_v43 = vsel %vm3375_vm7, %v1330_v41, %v1331_v52  ;;  %v1158_v38 = vrot.slane %v1156_v51, 5 }
  0xdf   : > { %v1773_v39 = vpop.permute.xlu1 %1772  ;;  %v1771_v44 = vpop.permute.xlu0 %1770 }
  0xe0   : > { %v2053_v14 = vsel %vm2047_vm5, %v2020_v20, %v1771_v44  ;;  %v1154_v20 = vrot.slane %v1153_v56, 4 }
  0xe1   : > { %1683 = vrot.lane.b32.xlu1 %v4158_v5, %s3265_s26  ;;  %1681 = vrot.lane.b32.xlu0 %v4093_v62, %s3265_s26  ;;  %v1956_v62 = vsel %vm1948_vm2, %v1923_v15, %v1668_v26  ;;  %v1125_v26 = vsel %vm3405_vm11, %v1120_v25, %v1124_v63  ;;  %v1335_v25 = vrot.slane %v4207_v34, 5  ;;  %v1170_v15 = vshll.u32 %v4243_v9, 16 }
  0xe2   : > { %v1989_v12 = vsel %vm1981_vm3, %v1956_v62, %v1703_v33  ;;  %v4214_v59 = vcombine.low %v1125_v26, %v1135_v54  ;;  %v4256_v62 = vcombine.low %v4202_v53, %v4207_v34  ;;  %v1338_v26 = vrot.slane %v787_v2, 5 }
  0xe3   : > { %v4182_v31 = vpop.permute.xlu1 %1519  ;;  %v1806_v4 = vpop.permute.xlu0 %1805  ;;  %v2022_v17 = vsel %vm2014_vm4, %v1989_v12, %v1738_v22  ;;  %v1329_v22 = vsel %vm3375_vm7, %v2810_v32, %v1328_v50  ;;  %v1159_v50 = vsel %vm3405_vm11, %v1154_v20, %v1158_v38  ;;  %v1172_v34 = vrot.slane %v1170_v15, 5  ;;  %v4322_v20 = vld [vmem:[#allocation2 + $0xc0] sm:$0xf]  ;;  %v4327_v15 = vld [vmem:[#allocation2 + $0xc4] sm:$0xf] }
  0xe4   : > { %v2086_v42 = vsel %vm2080_vm6, %v2053_v14, %v1806_v4  ;;  %v4239_v45 = vcombine.low %v1329_v22, %v1332_v43 }
  0xe5   : > { %1718 = vrot.lane.b32.xlu1 %v4174_v21, %s3263_s24  ;;  %1716 = vrot.lane.b32.xlu0 %v4119_v13, %s3263_s24  ;;  %v2055_v13 = vsel %vm2047_vm5, %v2022_v17, %v1773_v39  ;;  %v4241_v39 = vld [vmem:[#allocation2 + $0xb4] sm:$0xf]  ;;  %v1337_v17 = vrot.slane %v1335_v25, 4 }
  0xe6   : > { %3150 = vmatprep.mubr.msk.bf16.mxu0 %vm2133_vm8, %v2086_v42  ;;  %v1161_v55 = vshrl.u32 %v4241_v39, 16  ;;  %v1164_v28 = vshll.u32 %v4241_v39, 16  ;;  %v2811_v42 = vrot.slane %v4202_v53, 9  ;;  %v1176_v53 = vrot.slane %v1174_v30, 4 }
  0xe7   : > { %v4205_v40 = vpop.permute.xlu1 %1521  ;;  %v1808_v19 = vpop.permute.xlu0 %1807  ;;  %v1339_v58 = vsel %vm3375_vm7, %v1337_v17, %v1338_v26 }
  0xe8   : > { %v2088_v33 = vsel %vm2080_vm6, %v2055_v13, %v1808_v19  ;;  %v1163_v54 = vrot.slane %v1161_v55, 4  ;;  %v4267_v13 = vld [vmem:[#allocation2 + $0xbc] sm:$0x1]  ;;  %v1166_v19 = vrot.slane %v1164_v28, 5  ;;  %v1336_v49 = vsel %vm3375_vm7, %v2811_v42, %v1335_v25 }
  0xe9   : > { %1753 = vrot.lane.b32.xlu1 %v4193_v36, %s3262_s23  ;;  %1751 = vrot.lane.b32.xlu0 %v4136_v23, %s3262_s23  ;;  %v1180_v41 = vshll.u32 %v4267_v13, 16  ;;  %v1851_v43 = vsel %vm1833_vm15, %v3650_v16, %v4205_v40  ;;  %v1342_v55 = vrot.slane %v4243_v9, 5  ;;  %v1348_v42 = vshrl.u32 %v4322_v20, 16 }
  0xea   : > { %3151 = vmatmul.mubr.msk.bf16.gmra.mxu0 %vm2133_vm8, %v2088_v33  ;;  %v1167_v10 = vor.u32 %v1166_v19, %v1163_v54  ;;  %v1345_v26 = vrot.slane %v4267_v13, 5  ;;  %v1361_v54 = vshrl.u32 %v4327_v15, 16 }
  0xeb   : > { %v4223_v7 = vpop.permute.xlu1 %1601  ;;  %v1600_v63 = vpop.permute.xlu0 %1599  ;;  %v1344_v17 = vrot.slane %v1342_v55, 4 }
  0xec   : > { %v1894_v3 = vsel %vm1882_vm0, %v1851_v43, %v4223_v7  ;;  %v4313_v7 = vcombine.low %v4241_v39, %v4243_v9  ;;  %v2812_v9 = vrot.slane %v4241_v39, 9  ;;  %v1350_v39 = vrot.slane %v1348_v42, 4 }
  0xed   : > { %1788 = vrot.lane.b32.xlu1 %v4214_v59, %s3266_s27  ;;  %1786 = vrot.lane.b32.xlu0 %v4158_v5, %s3266_s27  ;;  %v1346_v13 = vsel %vm3375_vm7, %v1344_v17, %v1345_v26 }
  0xef   : > { %v4233_v37 = vpop.permute.xlu1 %1636  ;;  %v1635_v6 = vpop.permute.xlu0 %1634 }
  0xf0   : > { %v1927_v16 = vsel %vm1915_vm1, %v1894_v3, %v4233_v37 }
  0xf1   : > { %1535 = vrot.lane.b32.xlu1 %v4158_v5, %s3260_s21  ;;  %1821 = vrot.lane.b32.xlu0 %v4174_v21, %s3264_s25  ;;  %v1144_v5 = vrot.slane %v1143_v60, 4  ;;  %v1168_v60 = vrot.slane %v1167_v10, 4 }
  0xf3   : > { %v1672_v44 = vpop.permute.xlu1 %1671  ;;  %v1670_v8 = vpop.permute.xlu0 %1669  ;;  %v1149_v12 = vsel %vm3405_vm11, %v1144_v5, %v1148_v0  ;;  %v1182_v0 = vrot.slane %v1180_v41, 5 }
  0xf4   : > { %v4276_v48 = vcombine.low %v1149_v12, %v1159_v50  ;;  %v1351_v12 = vshll.u32 %v4322_v20, 16  ;;  %v1357_v50 = vshll.u32 %v4327_v15, 16 }
  0xf5   : > { %1537 = vrot.lane.b32.xlu1 %v4214_v59, %s3260_s21  ;;  %1823 = vrot.lane.b32.xlu0 %v4239_v45, %s3264_s25 }
  0xf7   : > { %v1707_v14 = vpop.permute.xlu1 %1706  ;;  %v1705_v4 = vpop.permute.xlu0 %1704 }
  0xf9   : > { %1617 = vrot.lane.b32.xlu1 %v4239_v45, %s3259_s20  ;;  %1615 = vrot.lane.b32.xlu0 %v4174_v21, %s3259_s20  ;;  %v1848_v21 = vsel %vm1833_vm15, %v3593_v29, %v4182_v31  ;;  %v1177_v29 = vor.u32 %v1176_v53, %v1172_v34  ;;  %v1353_v53 = vrot.slane %v1351_v12, 5 }
  0xfa   : > { %v1892_v52 = vsel %vm1882_vm0, %v1848_v21, %v1600_v63  ;;  %v4294_v63 = vcombine.low %v1336_v49, %v1339_v58  ;;  %v1363_v21 = vrot.slane %v1361_v54, 4 }
  0xfb   : > { %v1742_v33 = vpop.permute.xlu1 %1741  ;;  %v1740_v32 = vpop.permute.xlu0 %1739  ;;  %v1925_v31 = vsel %vm1915_vm1, %v1892_v52, %v1635_v6  ;;  %v1178_v51 = vrot.slane %v1177_v29, 4  ;;  %v793_v52 = vld [vmem:[#allocation2 + $0xc8] sm:$0x1]  ;;  %v1354_v10 = vor.u32 %v1353_v53, %v1350_v39  ;;  %v4361_v29 = vld [vmem:[#allocation2 + $0xcc] sm:$0xf] }
  0xfc   : > { %v1958_v22 = vsel %vm1948_vm2, %v1925_v31, %v1670_v8 }
  0xfd   : > { %1652 = vrot.lane.b32.xlu1 %v4256_v62, %s3261_s22  ;;  %1650 = vrot.lane.b32.xlu0 %v4193_v36, %s3261_s22  ;;  %v1991_v2 = vsel %vm1981_vm3, %v1958_v22, %v1705_v4  ;;  %v1183_v25 = vsel %vm3405_vm11, %v1178_v51, %v1182_v0  ;;  %v1385_v0 = vshll.u32 %v4361_v29, 16  ;;  %v1376_v51 = vrot.slane %v4327_v15, 5 }
  0xfe   : > { %v2024_v6 = vsel %vm2014_vm4, %v1991_v2, %v1740_v32  ;;  %v1359_v32 = vrot.slane %v1357_v50, 5  ;;  %v1382_v2 = vshrl.u32 %v4361_v29, 16 }
  0xff   : > { %v1777_v18 = vpop.permute.xlu1 %1776  ;;  %v1775_v11 = vpop.permute.xlu0 %1774 }
 0x100   : > { %v2057_v40 = vsel %vm2047_vm5, %v2024_v6, %v1775_v11  ;;  %v1364_v31 = vor.u32 %v1363_v21, %v1359_v32  ;;  %v4363_v11 = vld [vmem:[#allocation2 + $0xd0] sm:$0xf] }
 0x101   : > { %1687 = vrot.lane.b32.xlu1 %v4276_v48, %s3265_s26  ;;  %1685 = vrot.lane.b32.xlu0 %v4214_v59, %s3265_s26  ;;  %v1960_v59 = vsel %vm1948_vm2, %v1927_v16, %v1672_v44  ;;  %v1173_v44 = vsel %vm3405_vm11, %v1168_v60, %v1172_v34  ;;  %v1391_v3 = vshll.u32 %v4363_v11, 16  ;;  %v1395_v16 = vshrl.u32 %v4363_v11, 16 }
 0x102   : > { %v1993_v38 = vsel %vm1981_vm3, %v1960_v59, %v1707_v14  ;;  %v4334_v4 = vcombine.low %v1173_v44, %v1183_v25  ;;  %v1365_v6 = vrot.slane %v1364_v31, 4  ;;  %v1384_v59 = vrot.slane %v1382_v2, 4 }
 0x103   : > { %v4302_v56 = vpop.permute.xlu1 %1523  ;;  %v1810_v8 = vpop.permute.xlu0 %1809  ;;  %v2026_v37 = vsel %vm2014_vm4, %v1993_v38, %v1742_v33  ;;  %v1343_v33 = vsel %vm3375_vm7, %v2812_v9, %v1342_v55  ;;  %v2863_v38 = vcombine.low %v4322_v20, %v4327_v15  ;;  %v2813_v44 = vrot.slane %v4322_v20, 9 }
 0x104   : > { %v2090_v5 = vsel %vm2080_vm6, %v2057_v40, %v1810_v8  ;;  %v4359_v58 = vcombine.low %v1343_v33, %v1346_v13  ;;  %v1393_v25 = vrot.slane %v1391_v3, 5  ;;  %v1397_v9 = vrot.slane %v1395_v16, 4 }
 0x105   : > { %1722 = vrot.lane.b32.xlu1 %v4294_v63, %s3263_s24  ;;  %1720 = vrot.lane.b32.xlu0 %v4239_v45, %s3263_s24  ;;  %v2059_v45 = vsel %vm2047_vm5, %v2026_v37, %v1777_v18  ;;  %v1367_v18 = vshll.u32 %v793_v52, 16  ;;  %v1377_v54 = vsel %vm3375_vm7, %v2813_v44, %v1376_v51  ;;  %v2814_v3 = vrot.slane %v4361_v29, 9 }
 0x106   : > { %3154 = vmatprep.mubr.msk.bf16.mxu0 %vm2133_vm8, %v2090_v5  ;;  %v1387_v5 = vrot.slane %v1385_v0, 5  ;;  %v1398_v39 = vor.u32 %v1397_v9, %v1393_v25 }
 0x107   : > { %v4325_v28 = vpop.permute.xlu1 %1525  ;;  %v1812_v30 = vpop.permute.xlu0 %1811  ;;  %v1369_v60 = vrot.slane %v1367_v18, 5  ;;  %v1410_v18 = vrot.slane %v4363_v11, 5 }
 0x108   : > { %v2092_v14 = vsel %vm2080_vm6, %v2059_v45, %v1812_v30  ;;  %v1378_v45 = vrot.slane %v1376_v51, 4  ;;  %v1379_v30 = vrot.slane %v793_v52, 5  ;;  %v1388_v17 = vor.u32 %v1387_v5, %v1384_v59 }
 0x109   : > { %1757 = vrot.lane.b32.xlu1 %v4313_v7, %s3262_s23  ;;  %1755 = vrot.lane.b32.xlu0 %v4256_v62, %s3262_s23  ;;  %v1370_v55 = vsel %vm3405_vm11, %v1365_v6, %v1369_v60  ;;  %v1399_v31 = vrot.slane %v1398_v39, 4  ;;  %v1412_v60 = vrot.slane %v1410_v18, 4 }
 0x10a   : > { %3155 = vmatmul.mubr.msk.bf16.gmra.mxu0 %vm2133_vm8, %v2092_v14  ;;  %v796_v14 = vld [vmem:[#allocation2 + $0xd4] sm:$0x1]  ;;  %v1380_v50 = vsel %vm3375_vm7, %v1378_v45, %v1379_v30  ;;  %v1389_v13 = vrot.slane %v1388_v17, 4 }
 0x10b   : > { %v4343_v19 = vpop.permute.xlu1 %1605  ;;  %v1604_v34 = vpop.permute.xlu0 %1603  ;;  %v1401_v15 = vshll.u32 %v796_v14, 16  ;;  %v2865_v21 = vcombine.low %v1377_v54, %v1380_v50  ;;  %v1413_v51 = vrot.slane %v796_v14, 5 }
 0x10d   : > { %1792 = vrot.lane.b32.xlu1 %v4334_v4, %s3266_s27  ;;  %1790 = vrot.lane.b32.xlu0 %v4276_v48, %s3266_s27  ;;  %v1403_v52 = vrot.slane %v1401_v15, 5  ;;  %v1414_v35 = vsel %vm3375_vm7, %v1412_v60, %v1413_v51 }
 0x10f   : > { %v4353_v49 = vpop.permute.xlu1 %1640  ;;  %v1639_v41 = vpop.permute.xlu0 %1638 }
 0x111   : > { %1539 = vrot.lane.b32.xlu1 %v4276_v48, %s3260_s21  ;;  %1825 = vrot.lane.b32.xlu0 %v4294_v63, %s3264_s25  ;;  %v1355_v48 = vrot.slane %v1354_v10, 4 }
 0x113   : > { %v1676_v22 = vpop.permute.xlu1 %1675  ;;  %v1674_v43 = vpop.permute.xlu0 %1673  ;;  %v1360_v37 = vsel %vm3405_vm11, %v1355_v48, %v1359_v32  ;;  %v1857_v32 = vsel %vm1833_vm15, %v3785_v47, %v4325_v28 }
 0x114   : > { %v2864_v20 = vcombine.low %v1360_v37, %v1370_v55 }
 0x115   : > { %1541 = vrot.lane.b32.xlu1 %v4334_v4, %s3260_s21  ;;  %1827 = vrot.lane.b32.xlu0 %v4359_v58, %s3264_s25 }
 0x117   : > { %v1711_v40 = vpop.permute.xlu1 %1710  ;;  %v1709_v8 = vpop.permute.xlu0 %1708 }
 0x119   : > { %1621 = vrot.lane.b32.xlu1 %v4359_v58, %s3259_s20  ;;  %1619 = vrot.lane.b32.xlu0 %v4294_v63, %s3259_s20  ;;  %v1854_v63 = vsel %vm1833_vm15, %v3729_v46, %v4302_v56 }
 0x11a   : > { %v1896_v26 = vsel %vm1882_vm0, %v1854_v63, %v1604_v34 }
 0x11b   : > { %v1746_v42 = vpop.permute.xlu1 %1745  ;;  %v1744_v12 = vpop.permute.xlu0 %1743  ;;  %v1929_v53 = vsel %vm1915_vm1, %v1896_v26, %v1639_v41  ;;  %v1898_v41 = vsel %vm1882_vm0, %v1857_v32, %v4343_v19  ;;  %v2866_v19 = vcombine.low %v4361_v29, %v4363_v11 }
 0x11c   : > { %v1962_v56 = vsel %vm1948_vm2, %v1929_v53, %v1674_v43  ;;  %v1931_v47 = vsel %vm1915_vm1, %v1898_v41, %v4353_v49  ;;  %v1394_v49 = vsel %vm3405_vm11, %v1389_v13, %v1393_v25 }
 0x11d   : > { %1656 = vrot.lane.b32.xlu1 %v2863_v38, %s3261_s22  ;;  %1654 = vrot.lane.b32.xlu0 %v4313_v7, %s3261_s22  ;;  %v1995_v34 = vsel %vm1981_vm3, %v1962_v56, %v1709_v8  ;;  %v1964_v0 = vsel %vm1948_vm2, %v1931_v47, %v1676_v22  ;;  %v1404_v22 = vsel %vm3405_vm11, %v1399_v31, %v1403_v52 }
 0x11e   : > { %v2028_v10 = vsel %vm2014_vm4, %v1995_v34, %v1744_v12  ;;  %v1997_v48 = vsel %vm1981_vm3, %v1964_v0, %v1711_v40  ;;  %v2867_v29 = vcombine.low %v1394_v49, %v1404_v22  ;;  %v1411_v8 = vsel %vm3375_vm7, %v2814_v3, %v1410_v18 }
 0x11f   : > { %v1781_v33 = vpop.permute.xlu1 %1780  ;;  %v1779_v46 = vpop.permute.xlu0 %1778  ;;  %v2030_v6 = vsel %vm2014_vm4, %v1997_v48, %v1746_v42  ;;  %v2868_v37 = vcombine.low %v1411_v8, %v1414_v35 }
 0x120   : > { %v2061_v28 = vsel %vm2047_vm5, %v2028_v10, %v1779_v46  ;;  %v2063_v16 = vsel %vm2047_vm5, %v2030_v6, %v1781_v33 }
 0x121   : > { %1691 = vrot.lane.b32.xlu1 %v2864_v20, %s3265_s26  ;;  %1689 = vrot.lane.b32.xlu0 %v4334_v4, %s3265_s26 }
 0x123   : > { %v1528_v43 = vpop.permute.xlu1 %1527  ;;  %v1814_v2 = vpop.permute.xlu0 %1813 }
 0x124   : > { %v2094_v4 = vsel %vm2080_vm6, %v2061_v28, %v1814_v2  ;;  %v1860_v9 = vsel %vm1833_vm15, %v3873_v27, %v1528_v43 }
 0x125   : > { %1726 = vrot.lane.b32.xlu1 %v2865_v21, %s3263_s24  ;;  %1724 = vrot.lane.b32.xlu0 %v4359_v58, %s3263_s24 }
 0x126   : > { %3158 = vmatprep.mubr.msk.bf16.mxu0 %vm2133_vm8, %v2094_v4 }
 0x127   : > { %v1530_v58 = vpop.permute.xlu1 %1529  ;;  %v1816_v40 = vpop.permute.xlu0 %1815 }
 0x128   : > { %v2096_v11 = vsel %vm2080_vm6, %v2063_v16, %v1816_v40  ;;  %v1863_v15 = vsel %vm1833_vm15, %v3908_v57, %v1530_v58 }
 0x129   : > { %1761 = vrot.lane.b32.xlu1 %v2866_v19, %s3262_s23  ;;  %1759 = vrot.lane.b32.xlu0 %v2863_v38, %s3262_s23 }
 0x12a   : > { %3159 = vmatmul.mubr.msk.bf16.gmra.mxu0 %vm2133_vm8, %v2096_v11 }
 0x12b   : > { %v1610_v59 = vpop.permute.xlu1 %1609  ;;  %v1608_v5 = vpop.permute.xlu0 %1607 }
 0x12c   : > { %v1900_v42 = vsel %vm1882_vm0, %v1860_v9, %v1608_v5  ;;  %v1902_v54 = vsel %vm1882_vm0, %v1863_v15, %v1610_v59 }
 0x12d   : > { %1796 = vrot.lane.b32.xlu1 %v2867_v29, %s3266_s27  ;;  %1794 = vrot.lane.b32.xlu0 %v2864_v20, %s3266_s27 }
 0x12f   : > { %v1645_v44 = vpop.permute.xlu1 %1644  ;;  %v1643_v25 = vpop.permute.xlu0 %1642 }
 0x130   : > { %v1933_v12 = vsel %vm1915_vm1, %v1900_v42, %v1643_v25  ;;  %v1935_v39 = vsel %vm1915_vm1, %v1902_v54, %v1645_v44 }
 0x131   : > { %1831 = vrot.lane.b32.xlu1 %v2868_v37, %s3264_s25  ;;  %1829 = vrot.lane.b32.xlu0 %v2865_v21, %s3264_s25 }
 0x133   : > { %v1680_v38 = vpop.permute.xlu1 %1679  ;;  %v1678_v55 = vpop.permute.xlu0 %1677 }
 0x134   : > { %v1966_v20 = vsel %vm1948_vm2, %v1933_v12, %v1678_v55  ;;  %v1968_v46 = vsel %vm1948_vm2, %v1935_v39, %v1680_v38 }
 0x137   : > { %v1715_v45 = vpop.permute.xlu1 %1714  ;;  %v1713_v30 = vpop.permute.xlu0 %1712 }
 0x138   : > { %v1999_v26 = vsel %vm1981_vm3, %v1966_v20, %v1713_v30  ;;  %v2001_v13 = vsel %vm1981_vm3, %v1968_v46, %v1715_v45 }
 0x13b   : > { %v1750_v14 = vpop.permute.xlu1 %1749  ;;  %v1748_v1 = vpop.permute.xlu0 %1747 }
 0x13c   : > { %v2032_v50 = vsel %vm2014_vm4, %v1999_v26, %v1748_v1  ;;  %v2034_v57 = vsel %vm2014_vm4, %v2001_v13, %v1750_v14 }
 0x13f   : > { %v1785_v17 = vpop.permute.xlu1 %1784  ;;  %v1783_v63 = vpop.permute.xlu0 %1782 }
 0x140   : > { %v2065_v27 = vsel %vm2047_vm5, %v2032_v50, %v1783_v63  ;;  %v2067_v32 = vsel %vm2047_vm5, %v2034_v57, %v1785_v17 }
 0x143   : > { %v1532_v53 = vpop.permute.xlu1 %1531  ;;  %v1818_v33 = vpop.permute.xlu0 %1817 }
 0x144   : > { %v2098_v56 = vsel %vm2080_vm6, %v2065_v27, %v1818_v33  ;;  %v1866_v48 = vsel %vm1833_vm15, %v4005_v61, %v1532_v53 }
 0x145   : > { %3162 = vmatprep.mubr.msk.bf16.mxu0 %vm2133_vm8, %v2098_v56 }
 0x147   : > { %v1534_v34 = vpop.permute.xlu1 %1533  ;;  %v1820_v21 = vpop.permute.xlu0 %1819 }
 0x148   : > { %v2100_v52 = vsel %vm2080_vm6, %v2067_v32, %v1820_v21  ;;  %v1869_v60 = vsel %vm1833_vm15, %v4066_v24, %v1534_v34 }
 0x149   : > { %3163 = vmatmul.mubr.msk.bf16.gmra.mxu0 %vm2133_vm8, %v2100_v52 }
 0x14b   : > { %v1614_v41 = vpop.permute.xlu1 %1613  ;;  %v1612_v10 = vpop.permute.xlu0 %1611 }
 0x14c   : > { %v1904_v19 = vsel %vm1882_vm0, %v1866_v48, %v1612_v10  ;;  %v1906_v16 = vsel %vm1882_vm0, %v1869_v60, %v1614_v41 }
 0x14f   : > { %v1649_v31 = vpop.permute.xlu1 %1648  ;;  %v1647_v18 = vpop.permute.xlu0 %1646 }
 0x150   : > { %v1937_v49 = vsel %vm1915_vm1, %v1904_v19, %v1647_v18  ;;  %v1939_v40 = vsel %vm1915_vm1, %v1906_v16, %v1649_v31 }
 0x153   : > { %v1684_v47 = vpop.permute.xlu1 %1683  ;;  %v1682_v28 = vpop.permute.xlu0 %1681 }
 0x154   : > { %v1970_v22 = vsel %vm1948_vm2, %v1937_v49, %v1682_v28  ;;  %v1972_v8 = vsel %vm1948_vm2, %v1939_v40, %v1684_v47 }
 0x157   : > { %v1719_v43 = vpop.permute.xlu1 %1718  ;;  %v1717_v2 = vpop.permute.xlu0 %1716 }
 0x158   : > { %v2003_v51 = vsel %vm1981_vm3, %v1970_v22, %v1717_v2  ;;  %v2005_v59 = vsel %vm1981_vm3, %v1972_v8, %v1719_v43 }
 0x15b   : > { %v1754_v0 = vpop.permute.xlu1 %1753  ;;  %v1752_v4 = vpop.permute.xlu0 %1751 }
 0x15c   : > { %v2036_v58 = vsel %vm2014_vm4, %v2003_v51, %v1752_v4  ;;  %v2038_v24 = vsel %vm2014_vm4, %v2005_v59, %v1754_v0 }
 0x15f   : > { %v1789_v3 = vpop.permute.xlu1 %1788  ;;  %v1787_v6 = vpop.permute.xlu0 %1786 }
 0x160   : > { %v2069_v61 = vsel %vm2047_vm5, %v2036_v58, %v1787_v6  ;;  %v2071_v5 = vsel %vm2047_vm5, %v2038_v24, %v1789_v3 }
 0x163   : > { %v1536_v11 = vpop.permute.xlu1 %1535  ;;  %v1822_v29 = vpop.permute.xlu0 %1821 }
 0x164   : > { %v2102_v35 = vsel %vm2080_vm6, %v2069_v61, %v1822_v29  ;;  %v1872_v63 = vsel %vm1833_vm15, %v4136_v23, %v1536_v11 }
 0x165   : > { %3166 = vmatprep.mubr.msk.bf16.mxu0 %vm2133_vm8, %v2102_v35 }
 0x167   : > { %v1538_v37 = vpop.permute.xlu1 %1537  ;;  %v1824_v44 = vpop.permute.xlu0 %1823 }
 0x168   : > { %v2104_v25 = vsel %vm2080_vm6, %v2071_v5, %v1824_v44  ;;  %v1875_v39 = vsel %vm1833_vm15, %v4193_v36, %v1538_v37 }
 0x169   : > { %3167 = vmatmul.mubr.msk.bf16.gmra.mxu0 %vm2133_vm8, %v2104_v25 }
 0x16b   : > { %v1618_v38 = vpop.permute.xlu1 %1617  ;;  %v1616_v55 = vpop.permute.xlu0 %1615 }
 0x16c   : > { %v1908_v20 = vsel %vm1882_vm0, %v1872_v63, %v1616_v55  ;;  %v1910_v53 = vsel %vm1882_vm0, %v1875_v39, %v1618_v38 }
 0x16f   : > { %v1653_v45 = vpop.permute.xlu1 %1652  ;;  %v1651_v30 = vpop.permute.xlu0 %1650 }
 0x170   : > { %v1941_v15 = vsel %vm1915_vm1, %v1908_v20, %v1651_v30  ;;  %v1943_v46 = vsel %vm1915_vm1, %v1910_v53, %v1653_v45 }
 0x173   : > { %v1688_v14 = vpop.permute.xlu1 %1687  ;;  %v1686_v1 = vpop.permute.xlu0 %1685 }
 0x174   : > { %v1974_v50 = vsel %vm1948_vm2, %v1941_v15, %v1686_v1  ;;  %v1976_v57 = vsel %vm1948_vm2, %v1943_v46, %v1688_v14 }
 0x177   : > { %v1723_v9 = vpop.permute.xlu1 %1722  ;;  %v1721_v42 = vpop.permute.xlu0 %1720 }
 0x178   : > { %v2007_v27 = vsel %vm1981_vm3, %v1974_v50, %v1721_v42  ;;  %v2009_v34 = vsel %vm1981_vm3, %v1976_v57, %v1723_v9  ;;  %v3267_v57 = vmov 1.0  }
 0x179   : > { %2555 = vmatprep.mubr.f32.mxu1 %v3267_v57 }
 0x17b   : > { %v1758_v12 = vpop.permute.xlu1 %1757  ;;  %v1756_v17 = vpop.permute.xlu0 %1755 }
 0x17c   : > { %v2040_v33 = vsel %vm2014_vm4, %v2007_v27, %v1756_v17  ;;  %v2042_v36 = vsel %vm2014_vm4, %v2009_v34, %v1758_v12 }
 0x17f   : > { %v1793_v26 = vpop.permute.xlu1 %1792  ;;  %v1791_v54 = vpop.permute.xlu0 %1790 }
 0x180   : > { %v2073_v23 = vsel %vm2047_vm5, %v2040_v33, %v1791_v54  ;;  %v2075_v21 = vsel %vm2047_vm5, %v2042_v36, %v1793_v26 }
 0x183   : > { %v1540_v56 = vpop.permute.xlu1 %1539  ;;  %v1826_v13 = vpop.permute.xlu0 %1825 }
 0x184   : > { %v2106_v32 = vsel %vm2080_vm6, %v2073_v23, %v1826_v13  ;;  %v1878_v58 = vsel %vm1833_vm15, %v4256_v62, %v1540_v56 }
 0x185   : > { %3170 = vmatprep.mubr.msk.bf16.mxu0 %vm2133_vm8, %v2106_v32 }
 0x187   : > { %v1542_v52 = vpop.permute.xlu1 %1541  ;;  %v1828_v41 = vpop.permute.xlu0 %1827 }
 0x188   : > { %v2108_v10 = vsel %vm2080_vm6, %v2075_v21, %v1828_v41  ;;  %v1881_v16 = vsel %vm1833_vm15, %v4313_v7, %v1542_v52 }
 0x189   : > { %3171 = vmatmul.mubr.msk.bf16.gmra.mxu0 %vm2133_vm8, %v2108_v10 }
 0x18b   : > { %v1622_v31 = vpop.permute.xlu1 %1621  ;;  %v4500_v18 = vpop.f32.mrf.mxu0 }
 0x18c   : > { %v1620_v47 = vpop.permute.xlu0 %1619  ;;  %v1914_v40 = vsel %vm1882_vm0, %v1881_v16, %v1622_v31 }
 0x18d   : > { %v4502_v28 = vpop.f32.mrf.mxu0  ;;  %v1912_v61 = vsel %vm1882_vm0, %v1878_v58, %v1620_v47 }
 0x18f   : > { %v1657_v43 = vpop.permute.xlu1 %1656  ;;  %v4511_v2 = vpop.f32.mrf.mxu0 }
 0x190   : > { %v2964_v0 = vpack.c.bf16 %v4511_v2, %v4500_v18  ;;  %v1655_v4 = vpop.permute.xlu0 %1654  ;;  %v1947_v11 = vsel %vm1915_vm1, %v1914_v40, %v1657_v43 }
 0x191   : > { %v4515_v48 = vpop.f32.mrf.mxu0  ;;  %v1945_v8 = vsel %vm1915_vm1, %v1912_v61, %v1655_v4 }
 0x192   : > { %3036 = vst [vmem:[%s4509_s9 + $0x8] sm:$0xff] %v2964_v0   ;;  %v2959_v19 = vpack.c.bf16 %v4515_v48, %v4502_v28 }
 0x193   : > { %v1692_v49 = vpop.permute.xlu1 %1691 }
 0x194   : > { %2960 = vst [vmem:[%s4509_s9] sm:$0xff] %v2959_v19   ;;  %v1690_v3 = vpop.permute.xlu0 %1689  ;;  %v1980_v35 = vsel %vm1948_vm2, %v1947_v11, %v1692_v49 }
 0x195   : > { %v1978_v24 = vsel %vm1948_vm2, %v1945_v8, %v1690_v3 }
 0x197   : > { %v1727_v6 = vpop.permute.xlu1 %1726 }
 0x198   : > { %v1725_v22 = vpop.permute.xlu0 %1724  ;;  %v2013_v5 = vsel %vm1981_vm3, %v1980_v35, %v1727_v6 }
 0x199   : > { %v2011_v7 = vsel %vm1981_vm3, %v1978_v24, %v1725_v22 }
 0x19b   : > { %v1762_v60 = vpop.permute.xlu1 %1761 }
 0x19c   : > { %v1760_v51 = vpop.permute.xlu0 %1759  ;;  %v2046_v62 = vsel %vm2014_vm4, %v2013_v5, %v1762_v60 }
 0x19d   : > { %v2044_v37 = vsel %vm2014_vm4, %v2011_v7, %v1760_v51 }
 0x19f   : > { %v1797_v29 = vpop.permute.xlu1 %1796 }
 0x1a0   : > { %v1795_v59 = vpop.permute.xlu0 %1794  ;;  %v2079_v44 = vsel %vm2047_vm5, %v2046_v62, %v1797_v29 }
 0x1a1   : > { %v2077_v38 = vsel %vm2047_vm5, %v2044_v37, %v1795_v59 }
 0x1a3   : > { %v1832_v25 = vpop.permute.xlu1 %1831 }
 0x1a4   : > { %v2112_v55 = vsel %vm2080_vm6, %v2079_v44, %v1832_v25  ;;  %v1830_v45 = vpop.permute.xlu0 %1829 }
 0x1a5   : > { %v2110_v30 = vsel %vm2080_vm6, %v2077_v38, %v1830_v45 }
 0x1a6   : > { %3174 = vmatprep.mubr.msk.bf16.mxu0 %vm2133_vm8, %v2110_v30 }
 0x1a7   : > { %3175 = vmatmul.mubr.msk.bf16.gmra.mxu0 %vm2133_vm8, %v2112_v55 }
 0x1aa   : > { %v4541_v14 = vpop.f32.mrf.mxu0 }
 0x1ac   : > { %v4543_v1 = vpop.f32.mrf.mxu0 }
 0x1ae   : > { %v4545_v9 = vpop.f32.mrf.mxu0 }
 0x1af   : > { %v2974_v42 = vpack.c.bf16 %v4545_v9, %v4541_v14 }
 0x1b0   : > { %v4549_v12 = vpop.f32.mrf.mxu0 }
 0x1b1   : > { %3038 = vst [vmem:[%s4509_s9 + $0x18] sm:$0xff] %v2974_v42   ;;  %v2969_v17 = vpack.c.bf16 %v4549_v12, %v4543_v1  ;;  %v2568_v42 = vmul.f32 %v4545_v9, %v4545_v9 }
 0x1b3   : > { %3037 = vst [vmem:[%s4509_s9 + $0x10] sm:$0xff] %v2969_v17  }
 0x1ca   : > { %v4555_v63 = vpop.f32.mrf.mxu0 }
 0x1cb   : > { %v2571_v44 = vmul.f32 %v4555_v63, %v4555_v63 }
 0x1cc   : > { %v4557_v20 = vpop.f32.mrf.mxu0 }
 0x1cd   : > { %v2569_v45 = vmul.f32 %v4557_v20, %v4557_v20 }
 0x1ce   : > { %v4559_v15 = vpop.f32.mrf.mxu0 }
 0x1cf   : > { %v2984_v26 = vpack.c.bf16 %v4559_v15, %v4555_v63  ;;  %v2572_v62 = vmul.f32 %v4559_v15, %v4559_v15 }
 0x1d0   : > { %v4563_v54 = vpop.f32.mrf.mxu0 }
 0x1d1   : > { %3040 = vst [vmem:[%s4509_s9 + $0x28] sm:$0xff] %v2984_v26   ;;  %v2979_v50 = vpack.c.bf16 %v4563_v54, %v4557_v20  ;;  %v2570_v38 = vmul.f32 %v4563_v54, %v4563_v54  ;;  %v2565_v26 = vmul.f32 %v4543_v1, %v4543_v1 }
 0x1d3   : > { %3039 = vst [vmem:[%s4509_s9 + $0x20] sm:$0xff] %v2979_v50   ;;  %v2563_v50 = vmul.f32 %v4500_v18, %v4500_v18 }
 0x1ea   : > { %v4569_v39 = vpop.f32.mrf.mxu0 }
 0x1eb   : > { %v2575_v8 = vmul.f32 %v4569_v39, %v4569_v39 }
 0x1ec   : > { %v4571_v27 = vpop.f32.mrf.mxu0 }
 0x1ed   : > { %v2573_v5 = vmul.f32 %v4571_v27, %v4571_v27 }
 0x1ee   : > { %v4573_v53 = vpop.f32.mrf.mxu0 }
 0x1ef   : > { %v2994_v33 = vpack.c.bf16 %v4573_v53, %v4569_v39  ;;  %v2576_v11 = vmul.f32 %v4573_v53, %v4573_v53 }
 0x1f0   : > { %v4577_v46 = vpop.f32.mrf.mxu0 }
 0x1f1   : > { %3042 = vst [vmem:[%s4509_s9 + $0x38] sm:$0xff] %v2994_v33   ;;  %v2989_v23 = vpack.c.bf16 %v4577_v46, %v4571_v27  ;;  %v2574_v59 = vmul.f32 %v4577_v46, %v4577_v46 }
 0x1f3   : > { %3041 = vst [vmem:[%s4509_s9 + $0x30] sm:$0xff] %v2989_v23  }
 0x209   : > { %v4583_v56 = vpop.f32.mrf.mxu0 }
 0x20b   : > { %v4585_v13 = vpop.f32.mrf.mxu0 }
 0x20d   : > { %v4588_v32 = vpop.f32.mrf.mxu0 }
 0x20e   : > { %v3004_v34 = vpack.c.bf16 %v4588_v32, %v4583_v56 }
 0x20f   : > { %v4592_v36 = vpop.f32.mrf.mxu0 }
 0x210   : > { %3044 = vst [vmem:[%s4509_s9 + $0x48] sm:$0xff] %v3004_v34   ;;  %v2999_v21 = vpack.c.bf16 %v4592_v36, %v4585_v13 }
 0x212   : > { %3043 = vst [vmem:[%s4509_s9 + $0x40] sm:$0xff] %v2999_v21  }
 0x229   : > { %v4598_v52 = vpop.f32.mrf.mxu0 }
 0x22a   : > { %v2583_v17 = vmul.f32 %v4598_v52, %v4598_v52 }
 0x22b   : > { %v4600_v41 = vpop.f32.mrf.mxu0 }
 0x22d   : > { %v4602_v10 = vpop.f32.mrf.mxu0 }
 0x22e   : > { %v3014_v31 = vpack.c.bf16 %v4602_v10, %v4598_v52  ;;  %v2584_v30 = vmul.f32 %v4602_v10, %v4602_v10 }
 0x22f   : > { %v4606_v47 = vpop.f32.mrf.mxu0 }
 0x230   : > { %3046 = vst [vmem:[%s4509_s9 + $0x58] sm:$0xff] %v3014_v31   ;;  %v3009_v43 = vpack.c.bf16 %v4606_v47, %v4600_v41 }
 0x232   : > { %3045 = vst [vmem:[%s4509_s9 + $0x50] sm:$0xff] %v3009_v43  }
 0x249   : > { %v4612_v0 = vpop.f32.mrf.mxu0 }
 0x24a   : > { %v2587_v37 = vmul.f32 %v4612_v0, %v4612_v0 }
 0x24b   : > { %v4614_v4 = vpop.f32.mrf.mxu0 }
 0x24c   : > { %v2585_v55 = vmul.f32 %v4614_v4, %v4614_v4 }
 0x24d   : > { %v3173_v19 = vpop.f32.mrf.mxu0 }
 0x24e   : > { %v3024_v49 = vpack.c.bf16 %v3173_v19, %v4612_v0  ;;  %v2588_v7 = vmul.f32 %v3173_v19, %v3173_v19 }
 0x24f   : > { %v4617_v3 = vpop.f32.mrf.mxu0 }
 0x250   : > { %3048 = vst [vmem:[%s4509_s9 + $0x68] sm:$0xff] %v3024_v49   ;;  %v3019_v6 = vpack.c.bf16 %v4617_v3, %v4614_v4  ;;  %v2586_v25 = vmul.f32 %v4617_v3, %v4617_v3 }
 0x252   : > { %3047 = vst [vmem:[%s4509_s9 + $0x60] sm:$0xff] %v3019_v6  }
 0x267   : > { %v3176_v22 = vpop.f32.mrf.mxu0 }
 0x268   : > { %v2591_v29 = vmul.f32 %v3176_v22, %v3176_v22 }
 0x269   : > { %v2316_v60 = vpop.f32.mrf.mxu0 }
 0x26a   : > { %v2589_v24 = vmul.f32 %v2316_v60, %v2316_v60 }
 0x26b   : > { %v3177_v51 = vpop.f32.mrf.mxu0 }
 0x26c   : > { %v3034_v16 = vpack.c.bf16 %v3177_v51, %v3176_v22  ;;  %3070 = vmatprep.subr.mxu1 %v3177_v51  ;;  %v2592_v61 = vmul.f32 %v3177_v51, %v3177_v51 }
 0x26d   : > { %v2319_v58 = vpop.f32.mrf.mxu0  ;;  %3071 = vmatpush3.msra.mxu1 %v4573_v53 }
 0x26e   : > { %3050 = vst [vmem:[%s4509_s9 + $0x78] sm:$0xff] %v3034_v16   ;;  %v3029_v40 = vpack.c.bf16 %v2319_v58, %v2316_v60  ;;  %3072 = vmatprep.subr.mxu1 %v3176_v22  ;;  %v2590_v35 = vmul.f32 %v2319_v58, %v2319_v58 }
 0x26f   : > { %3073 = vmatpush3.msra.mxu1 %v4569_v39  ;;  %v2562_v39 = vmul.f32 %v4515_v48, %v4515_v48 }
 0x270   : > { %3049 = vst [vmem:[%s4509_s9 + $0x70] sm:$0xff] %v3029_v40   ;;  %3074 = vmatprep.subr.mxu1 %v2319_v58 }
 0x271   : > { %3075 = vmatpush3.msra.mxu1 %v4577_v46 }
 0x272   : > { %3076 = vmatprep.subr.mxu1 %v2316_v60 }
 0x273   : > { %3077 = vmatpush3.msra.mxu1 %v4571_v27  ;;  %v2561_v27 = vmul.f32 %v4502_v28, %v4502_v28 }
 0x274   : > { %3078 = vmatprep.subr.mxu1 %v3173_v19 }
 0x275   : > { %3079 = vmatpush3.msra.mxu1 %v4559_v15  ;;  %v2566_v15 = vmul.f32 %v4549_v12, %v4549_v12 }
 0x276   : > { %3080 = vmatprep.subr.mxu1 %v4612_v0 }
 0x277   : > { %3081 = vmatpush3.msra.mxu1 %v4555_v63  ;;  %v2567_v63 = vmul.f32 %v4541_v14, %v4541_v14 }
 0x278   : > { %3082 = vmatprep.subr.mxu1 %v4617_v3 }
 0x279   : > { %3083 = vmatpush3.msra.mxu1 %v4563_v54  ;;  %v2564_v54 = vmul.f32 %v4511_v2, %v4511_v2 }
 0x27a   : > { %3084 = vmatprep.subr.mxu1 %v4614_v4 }
 0x27b   : > { %3085 = vmatpush3.msra.mxu1 %v4557_v20  ;;  %v2582_v20 = vmul.f32 %v4606_v47, %v4606_v47 }
 0x27c   : > { %3086 = vmatprep.subr.mxu1 %v4602_v10 }
 0x27d   : > { %3087 = vmatpush3.msra.mxu1 %v4545_v9  ;;  %v2581_v9 = vmul.f32 %v4600_v41, %v4600_v41 }
 0x27e   : > { %3088 = vmatprep.subr.mxu1 %v4598_v52 }
 0x27f   : > { %3089 = vmatpush3.msra.mxu1 %v4541_v14  ;;  %v2580_v14 = vmul.f32 %v4588_v32, %v4588_v32 }
 0x280   : > { %3090 = vmatprep.subr.mxu1 %v4606_v47 }
 0x281   : > { %3091 = vmatpush3.msra.mxu1 %v4549_v12  ;;  %v2579_v12 = vmul.f32 %v4583_v56, %v4583_v56 }
 0x282   : > { %3092 = vmatprep.subr.mxu1 %v4600_v41 }
 0x283   : > { %3093 = vmatpush3.msra.mxu1 %v4543_v1  ;;  %v2578_v1 = vmul.f32 %v4592_v36, %v4592_v36 }
 0x284   : > { %3094 = vmatprep.subr.mxu1 %v4588_v32 }
 0x285   : > { %3095 = vmatpush3.msra.mxu1 %v4511_v2  ;;  %v2577_v2 = vmul.f32 %v4585_v13, %v4585_v13 }
 0x286   : > { %3096 = vmatprep.subr.mxu1 %v4583_v56 }
 0x287   : > { %3097 = vmatpush3.msra.mxu1 %v4500_v18  ;;  %v3268_v18 = vmov 0.0  }
 0x288   : > { %3098 = vmatprep.subr.mxu1 %v4592_v36  ;;  %2666 = vst [vmem:[%s204_s17] sm:$0xff] %v3268_v18 }
 0x289   : > { %3099 = vmatpush3.msra.mxu1 %v4515_v48 }
 0x28a   : > { %3100 = vmatprep.subr.mxu1 %v4585_v13 }
 0x28b   : > { %3101 = vmatpush3.msra.mxu1 %v4502_v28 }
 0x28c   : > { %2556 = vmatmul.mubr.f32.vlgmr.msra.gmra.mxu1 %v3267_v57  ;;  %3105 = vmatprep.subr.mxu1 %v2592_v61 }
 0x28d   : > { %3106 = vmatpush3.msra.mxu1 %v2576_v11  ;;  %2657 = vmatprep.mubr.f32.mxu1 %v3267_v57 }
 0x28e   : > { %3107 = vmatprep.subr.mxu1 %v2591_v29 }
 0x28f   : > { %3108 = vmatpush3.msra.mxu1 %v2575_v8  ;;  %v2667_v33 = vld [vmem:[%s204_s17] sm:$0x1]  ;;  %v2670_v13 = vld [vmem:[%s204_s17 + $0x1] sm:$0x1] }
 0x290   : > { %3109 = vmatprep.subr.mxu1 %v2590_v35 }
 0x291   : > { %3110 = vmatpush3.msra.mxu1 %v2574_v59 }
 0x292   : > { %3111 = vmatprep.subr.mxu1 %v2589_v24 }
 0x293   : > { %3112 = vmatpush3.msra.mxu1 %v2573_v5 }
 0x294   : > { %3113 = vmatprep.subr.mxu1 %v2588_v7 }
 0x295   : > { %3114 = vmatpush3.msra.mxu1 %v2572_v62 }
 0x296   : > { %3115 = vmatprep.subr.mxu1 %v2587_v37 }
 0x297   : > { %3116 = vmatpush3.msra.mxu1 %v2571_v44 }
 0x298   : > { %3117 = vmatprep.subr.mxu1 %v2586_v25 }
 0x299   : > { %3118 = vmatpush3.msra.mxu1 %v2570_v38 }
 0x29a   : > { %3119 = vmatprep.subr.mxu1 %v2585_v55 }
 0x29b   : > { %3120 = vmatpush3.msra.mxu1 %v2569_v45 }
 0x29c   : > { %3121 = vmatprep.subr.mxu1 %v2584_v30 }
 0x29d   : > { %3122 = vmatpush3.msra.mxu1 %v2568_v42 }
 0x29e   : > { %3123 = vmatprep.subr.mxu1 %v2583_v17 }
 0x29f   : > { %3124 = vmatpush3.msra.mxu1 %v2567_v63 }
 0x2a0   : > { %3125 = vmatprep.subr.mxu1 %v2582_v20 }
 0x2a1   : > { %3126 = vmatpush3.msra.mxu1 %v2566_v15 }
 0x2a2   : > { %3127 = vmatprep.subr.mxu1 %v2581_v9 }
 0x2a3   : > { %3128 = vmatpush3.msra.mxu1 %v2565_v26 }
 0x2a4   : > { %3129 = vmatprep.subr.mxu1 %v2580_v14 }
 0x2a5   : > { %3130 = vmatpush3.msra.mxu1 %v2564_v54 }
 0x2a6   : > { %3131 = vmatprep.subr.mxu1 %v2579_v12 }
 0x2a7   : > { %3132 = vmatpush3.msra.mxu1 %v2563_v50 }
 0x2a8   : > { %3133 = vmatprep.subr.mxu1 %v2578_v1 }
 0x2a9   : > { %3134 = vmatpush3.msra.mxu1 %v2562_v39 }
 0x2aa   : > { %3135 = vmatprep.subr.mxu1 %v2577_v2 }
 0x2ab   : > { %3136 = vmatpush3.msra.mxu1 %v2561_v27 }
 0x2ac   : > { %2658 = vmatmul.mubr.f32.vlgmr.msra.gmra.mxu1 %v3267_v57 }
 0x34c   : > { %v3102_v48 = vpop.f32.mrf.mxu1 }
 0x34e   : > { %v3103_v53 = vpop.f32.mrf.mxu1 }
 0x34f   : > { %v3104_v46 = vadd.f32 %v3103_v53, %v3102_v48 }
 0x351   : > { %v2668_v23 = vadd.f32 %v3104_v46, %v2667_v33 }
 0x353   : > { %2669 = vst [vmem:[%s204_s17] sm:$0x1] %v2668_v23 }
 0x36c   : > { %v3137_v56 = vpop.f32.mrf.mxu1 }
 0x36e   : > { %v3138_v28 = vpop.f32.mrf.mxu1 }
 0x36f   : > { %v3139_v32 = vadd.f32 %v3138_v28, %v3137_v56 }
 0x371   : > { %v2671_v34 = vadd.f32 %v3139_v32, %v2670_v13 }
 0x373   : > { %2672 = vst [vmem:[%s204_s17 + $0x1] sm:$0x1] %v2671_v34 }
 0x374 PF: > { %s14_s14 = sadd.s32 1, %s3256_s14   ;;  %s4736_s12 = smov %s3252_s13 }
 0x375   : > { %p11_p5 = scmp.ge.s32.totalorder %s14_s14, 4   ;;  %s4737_s13 = smov %s4739_s15 }
 0x377   :  { %13 = sbr.rel (!%p11_p5) target bundleno = 2 (0x2), region = 80 }

</bundles_post_ra>
